<compile_context>
chip_gen: v5e
topology: v5e:2x2
jax: 0.10.0
libtpu: 0.0.40
codegen_flags: <defaults>
</compile_context>

<pallas_src>
import functools

import jax
import jax.numpy as jnp
from jax.experimental import pallas as pl
from jax.experimental.pallas import tpu as pltpu


# --------------------------------------------------------------------------- kernel
def context_attention_kernel(x_ref, wT_ref, b_ref, cvmat_ref, expand_ref, o_ref):
    # x_ref:      (TB, T, D)  tile of batch elements (original dtype, used for masking)
    # wT_ref:     (D, D)      transposed Linear weight (compute dtype; grid-invariant)
    # b_ref:      (1, D)      Linear bias (f32)
    # cvmat_ref:  (D, H)      block-diagonal context vectors (compute dtype)
    # expand_ref: (H, D)      0/1 head -> feature expansion (f32)
    # o_ref:      (TB, D)     pooled output for this batch tile
    TB, T, D = x_ref.shape
    cd = wT_ref.dtype                       # MXU operand dtype (f32 or bf16)

    x = x_ref[...]                          # (TB, T, D) original dtype
    xm = x if x.dtype == cd else x.astype(cd)   # no extra copy when dtypes match

    # attention = tanh(Linear(x)); matmul M-dim = TB*T, f32 accumulation, f32 tanh.
    a = jnp.tanh(
        jnp.dot(xm.reshape(TB * T, D), wT_ref[...],
                preferred_element_type=jnp.float32)
        + b_ref[...]
    )                                                                  # (TB*T, D) f32

    # per-head similarity via block-diagonal (D, H) matmul on the MXU.
    sim = jnp.dot(a.astype(cd), cvmat_ref[...],
                  preferred_element_type=jnp.float32)                  # (TB*T, H)
    sim_t = jnp.swapaxes(sim.reshape(TB, T, -1), 1, 2)                 # (TB, H, T)

    # mask: timesteps whose original feature vector sums to zero -> -1e10.
    # (reduce x directly; no full f32 copy is materialized)
    row_is_pad = (jnp.sum(x, axis=-1, dtype=jnp.float32) == 0.0)[:, None, :]
    sim_t = jnp.where(row_is_pad, jnp.float32(-1e10), sim_t)           # (TB, H, T)

    # softmax over the sequence axis, per batch element & head, in f32.
    # Fully-masked elements degenerate to uniform weights (matches PyTorch).
    m = jnp.max(sim_t, axis=-1, keepdims=True)                         # (TB, H, 1)
    e = jnp.exp(sim_t - m)                                             # (TB, H, T)
    wgt = e / jnp.sum(e, axis=-1, keepdims=True)                       # (TB, H, T)

    # pooling on the MXU: P[b, h, d] = sum_t wgt[b, h, t] * x[b, t, d]   (K = T)
    P = jnp.einsum('bht,btd->bhd', wgt.astype(cd), xm,
                   preferred_element_type=jnp.float32)                 # (TB, H, D) f32

    # out[b, d] = P[b, head(d), d]  ==  sum_h expand[h, d] * P[b, h, d]
    out = jnp.sum(P * expand_ref[...][None, :, :], axis=1)             # (TB, D) f32
    o_ref[...] = out.astype(o_ref.dtype)


# ------------------------------------------------------------------- tile selection
def _vmem_budget():
    """(vmem_limit_bytes for the compiler, usable byte budget for tile sizing)."""
    try:
        cap = int(pltpu.get_tpu_info().vmem_capacity_bytes)
    except Exception:
        cap = 64 * 1024 * 1024          # conservative fallback (v7x per-core VMEM)
    # leave headroom for compiler-internal scratch: ~48 MiB on v7x, ~96 MiB on v5e/v6e
    limit = min(int(cap * 0.75), 100 * 1024 * 1024)
    budget = int(limit * 0.85)
    return limit, budget


def _pick_batch_tile(B, T, D, x_itemsize, cd_itemsize, budget):
    """Largest batch tile that fits VMEM, prefers TB*T in [256, 1024], keeps >= 2
    grid steps (v7x megacore), and avoids a wrapper-side zero-pad when possible."""
    # steady-state VMEM bytes per batch row:
    #   double-buffered x tile + ~3 live (T, D) f32 intermediates + double-buffered out row
    per_row = 2 * T * D * x_itemsize + 3 * T * D * 4 + 2 * D * 4
    # grid-invariant operands (single-buffered): W^T + bias/cvmat/expand (small)
    fixed = D * D * cd_itemsize + 16 * D * 4
    cap = max(1, (budget - fixed) // per_row)
    cap = min(cap, max(1, 1024 // max(T, 1)), B)       # TB*T sweet spot upper bound
    if cap > max(1, B // 2):                           # keep >= 2 grid steps
        cap = max(1, B // 2)
    cap = int(max(1, cap))
    # largest divisor of B that fits -> no batch-pad concatenate (extra HBM pass on x)
    best_div = 1
    for d in range(1, cap + 1):
        if B % d == 0:
            best_div = d
    if best_div * 2 >= cap:
        return best_div, False
    return cap, True                                    # rare fallback: pad the tail


# ------------------------------------------------------------------------- wrapper
@functools.partial(jax.jit, static_argnames=("num_head", "batch_tile", "compute_dtype"))
def context_attention(x, weight, bias, context_vector, *, num_head,
                      batch_tile=None, compute_dtype=None):
    """Pallas implementation of ContextAttention.forward (head_size != 1 path).

    compute_dtype: dtype for MXU matmul operands (e.g. jnp.bfloat16); accumulation,
    tanh, softmax and masking are always f32. None -> use x.dtype. For the HBM-bound
    regime, pass x itself in bf16 (HBM traffic is set by x.dtype, not compute_dtype).
    """
    B, T, D = x.shape
    if D % num_head != 0:
        raise ValueError("size must be dividable by num_head", D, num_head)
    head_size = D // num_head
    # TODO(synk): head_size == 1 branch (softmax over raw linear output) not implemented.
    assert head_size != 1, "head_size == 1 branch not implemented"

    cd = jnp.dtype(x.dtype) if compute_dtype is None else jnp.dtype(compute_dtype)

    wT = weight.T.astype(cd)                                           # (D, D)
    b2 = bias.reshape(1, D).astype(jnp.float32)                        # (1, D)

    # expand[h, h*hs + s] = 1       (H, D), f32 (exact 0/1)
    expand = jnp.kron(jnp.eye(num_head, dtype=jnp.float32),
                      jnp.ones((1, head_size), dtype=jnp.float32))     # (H, D)
    # cvmat[h*hs + s, h] = context_vector[h, s, 0]   (block diagonal, D x H)
    cv_flat = context_vector.reshape(D).astype(jnp.float32)            # (D,)
    cvmat = (expand.T * cv_flat[:, None]).astype(cd)                   # (D, H)

    vmem_limit, budget = _vmem_budget()
    if batch_tile is None:
        TB, need_pad = _pick_batch_tile(B, T, D, jnp.dtype(x.dtype).itemsize,
                                        cd.itemsize, budget)
    else:
        TB = max(1, min(int(batch_tile), B))
        need_pad = (B % TB) != 0

    if need_pad:
        B_pad = ((B + TB - 1) // TB) * TB
        # zero-padded elements hit the all-masked path -> exact zeros, discarded below
        x_in = jnp.concatenate([x, jnp.zeros((B_pad - B, T, D), x.dtype)], axis=0)
    else:
        B_pad = B
        x_in = x

    inv = dict(pipeline_mode=pl.Buffered(1))   # grid-invariant: single-buffer

    out = pl.pallas_call(
        context_attention_kernel,
        out_shape=jax.ShapeDtypeStruct((B_pad, D), x.dtype),
        grid=(B_pad // TB,),
        in_specs=[
            pl.BlockSpec((TB, T, D), lambda b: (b, 0, 0)),            # x tile (streamed)
            pl.BlockSpec((D, D), lambda b: (0, 0), **inv),            # W^T
            pl.BlockSpec((1, D), lambda b: (0, 0), **inv),            # bias
            pl.BlockSpec((D, num_head), lambda b: (0, 0), **inv),     # cvmat
            pl.BlockSpec((num_head, D), lambda b: (0, 0), **inv),     # expand
        ],
        out_specs=pl.BlockSpec((TB, D), lambda b: (b, 0)),
        compiler_params=pltpu.CompilerParams(
            dimension_semantics=("parallel",),
            vmem_limit_bytes=vmem_limit,
        ),
    )(x_in, wT, b2, cvmat, expand)
    return out[:B]


# ----------------------------------------------------------------------- reference
def context_attention_ref(x, weight, bias, context_vector, num_head):
    """Pure-JAX reference mirroring the PyTorch forward exactly."""
    B, T, D = x.shape
    hs = D // num_head
    a = jnp.tanh(x @ weight.T + bias)                                  # (B, T, D)
    a_split = a.reshape(B, T, num_head, hs)                            # (B, T, H, hs)
    cv = context_vector.reshape(num_head, hs)                          # (H, hs)
    sim = jnp.einsum("bthd,hd->bth", a_split, cv)                      # (B, T, H)
    mask = (x.sum(-1) == 0)[..., None]                                 # (B, T, 1)
    sim = jnp.where(mask, jnp.float32(-1e10), sim)
    w = jax.nn.softmax(sim, axis=1)                                    # (B, T, H)
    x_split = x.reshape(B, T, num_head, hs)
    weighted = x_split * w[..., None]
    return weighted.reshape(B, T, D).sum(axis=1)                       # (B, D)


if __name__ == "__main__":
    B, T, D, H = 16, 8, 32, 4     # auto tile picks TB=8 -> grid extent 2

    key = jax.random.PRNGKey(0)
    kx, kw, kb, kc = jax.random.split(key, 4)

    x = jax.random.normal(kx, (B, T, D), dtype=jnp.float32)
    # exercise the masking path: one padded timestep and one fully padded batch element
    x = x.at[0, T - 1, :].set(0.0)
    x = x.at[1].set(0.0)

    # nn.Linear(size, size): weight (D, D), bias (D,)
    bound = 1.0 / (D ** 0.5)
    weight = jax.random.uniform(kw, (D, D), minval=-bound, maxval=bound, dtype=jnp.float32)
    bias = jax.random.uniform(kb, (D,), minval=-bound, maxval=bound, dtype=jnp.float32)
    # context_vector: (num_head, head_size, 1), uniform(-1, 1)
    context_vector = jax.random.uniform(
        kc, (H, D // H, 1), minval=-1.0, maxval=1.0, dtype=jnp.float32
    )

    ref = context_attention_ref(x, weight, bias, context_vector, H)

    # full-precision path
    out = jax.block_until_ready(
        context_attention(x, weight, bias, context_vector, num_head=H)
    )
    assert out.shape == (B, D)
    assert jnp.allclose(out, ref, atol=1e-4, rtol=1e-4), "f32 kernel mismatch vs reference"

    # bf16 MXU-operand path (f32 accumulation); loose tolerance vs the f32 reference
    out_bf16 = jax.block_until_ready(
        context_attention(x, weight, bias, context_vector, num_head=H,
                          compute_dtype=jnp.bfloat16)
    )
    assert out_bf16.shape == (B, D)
    assert jnp.allclose(out_bf16, ref, atol=1e-1, rtol=1e-1), "bf16 kernel mismatch vs reference"

    # bf16 x streamed from HBM (halves the dominant DMA in the mem-bound regime)
    out_stream = jax.block_until_ready(
        context_attention(x.astype(jnp.bfloat16), weight, bias, context_vector, num_head=H)
    )
    assert out_stream.shape == (B, D)
    assert jnp.allclose(out_stream.astype(jnp.float32), ref, atol=2.5e-1, rtol=2.5e-1), \
        "bf16-streamed kernel mismatch vs reference"

    print("KERNEL_OK")
</pallas_src>

<mosaic_0001>
module attributes {stable_mosaic.version = 11 : i64} {
  func.func @context_attention_kernel(%arg0: i32, %arg1: memref<8x8x32xf32, #tpu.memory_space<vmem>>, %arg2: memref<32x32xf32, #tpu.memory_space<vmem>>, %arg3: memref<1x32xf32, #tpu.memory_space<vmem>>, %arg4: memref<32x4xf32, #tpu.memory_space<vmem>>, %arg5: memref<4x32xf32, #tpu.memory_space<vmem>>, %arg6: memref<8x32xf32, #tpu.memory_space<vmem>>) attributes {dimension_semantics = [#tpu.dimension_semantics<parallel>], iteration_bounds = array<i64: 2>, scalar_prefetch = 0 : i64, scratch_operands = 0 : i64, tpu.core_type = #tpu.core_type<tc>, window_params = [{transform_indices = @transform_0, window_bounds = array<i64: 8, 8, 32>}, {pipeline_mode = #tpu.pipeline_mode<synchronous>, transform_indices = @transform_1, window_bounds = array<i64: 32, 32>}, {pipeline_mode = #tpu.pipeline_mode<synchronous>, transform_indices = @transform_2, window_bounds = array<i64: 1, 32>}, {pipeline_mode = #tpu.pipeline_mode<synchronous>, transform_indices = @transform_3, window_bounds = array<i64: 32, 4>}, {pipeline_mode = #tpu.pipeline_mode<synchronous>, transform_indices = @transform_4, window_bounds = array<i64: 4, 32>}, {transform_indices = @transform_5, window_bounds = array<i64: 8, 32>}]} {
    %c0 = arith.constant 0 : index
    %c0_0 = arith.constant 0 : index
    %c0_1 = arith.constant 0 : index
    %0 = vector.load %arg1[%c0, %c0_0, %c0_1] : memref<8x8x32xf32, #tpu.memory_space<vmem>>, vector<8x8x32xf32>
    %1 = vector.shape_cast %0 : vector<8x8x32xf32> to vector<64x32xf32>
    %c0_2 = arith.constant 0 : index
    %c0_3 = arith.constant 0 : index
    %2 = vector.load %arg2[%c0_2, %c0_3] : memref<32x32xf32, #tpu.memory_space<vmem>>, vector<32x32xf32>
    %cst = arith.constant dense<0.000000e+00> : vector<64x32xf32>
    %3 = tpu.matmul %1, %2, %cst {dimension_numbers = #tpu.dot_dimension_numbers<[1], [0], [0], [1], [0, 0, 1, 1], [], []>} : vector<64x32xf32>, vector<32x32xf32>, vector<64x32xf32> -> vector<64x32xf32>
    %c0_4 = arith.constant 0 : index
    %c0_5 = arith.constant 0 : index
    %4 = vector.load %arg3[%c0_4, %c0_5] : memref<1x32xf32, #tpu.memory_space<vmem>>, vector<1x32xf32>
    %5 = vector.broadcast %4 : vector<1x32xf32> to vector<64x32xf32>
    %6 = arith.addf %3, %5 : vector<64x32xf32>
    %7 = math.tanh %6 : vector<64x32xf32>
    %c0_6 = arith.constant 0 : index
    %c0_7 = arith.constant 0 : index
    %8 = vector.load %arg4[%c0_6, %c0_7] : memref<32x4xf32, #tpu.memory_space<vmem>>, vector<32x4xf32>
    %cst_8 = arith.constant dense<0.000000e+00> : vector<64x4xf32>
    %9 = tpu.matmul %7, %8, %cst_8 {dimension_numbers = #tpu.dot_dimension_numbers<[1], [0], [0], [1], [0, 0, 1, 1], [], []>} : vector<64x32xf32>, vector<32x4xf32>, vector<64x4xf32> -> vector<64x4xf32>
    %10 = vector.shape_cast %9 : vector<64x4xf32> to vector<8x8x4xf32>
    %11 = tpu.transpose %10, [0, 2, 1] : vector<8x8x4xf32> -> vector<8x4x8xf32>
    %cst_9 = arith.constant dense<0.000000e+00> : vector<8x8xf32>
    %12 = vector.multi_reduction <add>, %0, %cst_9 [2] : vector<8x8x32xf32> to vector<8x8xf32>
    %cst_10 = arith.constant 0.000000e+00 : f32
    %13 = vector.broadcast %cst_10 : f32 to vector<8x8xf32>
    %14 = arith.cmpf oeq, %12, %13 : vector<8x8xf32>
    %15 = vector.shape_cast %14 : vector<8x8xi1> to vector<8x1x8xi1>
    %cst_11 = arith.constant -1.000000e+10 : f32
    %16 = vector.shape_cast %15 : vector<8x1x8xi1> to vector<8x1x8xi1>
    %17 = vector.broadcast %16 : vector<8x1x8xi1> to vector<8x4x8xi1>
    %18 = vector.broadcast %cst_11 : f32 to vector<8x4x8xf32>
    %19 = arith.select %17, %18, %11 : vector<8x4x8xi1>, vector<8x4x8xf32>
    %cst_12 = arith.constant dense<0xFF800000> : vector<8x4xf32>
    %20 = vector.multi_reduction <maximumf>, %19, %cst_12 [2] : vector<8x4x8xf32> to vector<8x4xf32>
    %21 = vector.shape_cast %20 : vector<8x4xf32> to vector<8x4x1xf32>
    %22 = vector.broadcast %21 : vector<8x4x1xf32> to vector<8x4x8xf32>
    %23 = arith.subf %19, %22 : vector<8x4x8xf32>
    %24 = math.exp %23 : vector<8x4x8xf32>
    %cst_13 = arith.constant dense<0.000000e+00> : vector<8x4xf32>
    %25 = vector.multi_reduction <add>, %24, %cst_13 [2] : vector<8x4x8xf32> to vector<8x4xf32>
    %26 = vector.shape_cast %25 : vector<8x4xf32> to vector<8x4x1xf32>
    %27 = vector.broadcast %26 : vector<8x4x1xf32> to vector<8x4x8xf32>
    %28 = arith.divf %24, %27 : vector<8x4x8xf32>
    "tpu.trace_start"() <{level = 10 : i32, message = "bht,btd->bhd"}> : () -> ()
    %cst_14 = arith.constant dense<0.000000e+00> : vector<8x4x32xf32>
    %29 = tpu.matmul %28, %0, %cst_14 {dimension_numbers = #tpu.dot_dimension_numbers<[2], [1], [1], [2], [0, 0, 0, 1, 1, 2], [0], [0]>} : vector<8x4x8xf32>, vector<8x8x32xf32>, vector<8x4x32xf32> -> vector<8x4x32xf32>
    "tpu.trace_stop"() : () -> ()
    %c0_15 = arith.constant 0 : index
    %c0_16 = arith.constant 0 : index
    %30 = vector.load %arg5[%c0_15, %c0_16] : memref<4x32xf32, #tpu.memory_space<vmem>>, vector<4x32xf32>
    %31 = vector.shape_cast %30 : vector<4x32xf32> to vector<1x4x32xf32>
    %32 = vector.broadcast %31 : vector<1x4x32xf32> to vector<8x4x32xf32>
    %33 = arith.mulf %29, %32 : vector<8x4x32xf32>
    %cst_17 = arith.constant dense<0.000000e+00> : vector<8x32xf32>
    %34 = vector.multi_reduction <add>, %33, %cst_17 [1] : vector<8x4x32xf32> to vector<8x32xf32>
    %c0_18 = arith.constant 0 : index
    %c0_19 = arith.constant 0 : index
    %35 = vector.load %arg6[%c0_18, %c0_19] : memref<8x32xf32, #tpu.memory_space<vmem>>, vector<8x32xf32>
    tpu.vector_store %arg6[%c0_18, %c0_19], %34 {strides = array<i32>} : memref<8x32xf32, #tpu.memory_space<vmem>>, vector<8x32xf32>,
    return
  }
  func.func @transform_0(%arg0: i32) -> (i32, i32, i32) {
    %c0_i32 = arith.constant 0 : i32
    %c0_i32_0 = arith.constant 0 : i32
    %c0_i32_1 = arith.constant 0 : i32
    return %arg0, %c0_i32, %c0_i32_0 : i32, i32, i32
  }
  func.func @transform_1(%arg0: i32) -> (i32, i32) {
    %c0_i32 = arith.constant 0 : i32
    %c0_i32_0 = arith.constant 0 : i32
    %c0_i32_1 = arith.constant 0 : i32
    return %c0_i32, %c0_i32_0 : i32, i32
  }
  func.func @transform_2(%arg0: i32) -> (i32, i32) {
    %c0_i32 = arith.constant 0 : i32
    %c0_i32_0 = arith.constant 0 : i32
    %c0_i32_1 = arith.constant 0 : i32
    return %c0_i32, %c0_i32_0 : i32, i32
  }
  func.func @transform_3(%arg0: i32) -> (i32, i32) {
    %c0_i32 = arith.constant 0 : i32
    %c0_i32_0 = arith.constant 0 : i32
    %c0_i32_1 = arith.constant 0 : i32
    return %c0_i32, %c0_i32_0 : i32, i32
  }
  func.func @transform_4(%arg0: i32) -> (i32, i32) {
    %c0_i32 = arith.constant 0 : i32
    %c0_i32_0 = arith.constant 0 : i32
    %c0_i32_1 = arith.constant 0 : i32
    return %c0_i32, %c0_i32_0 : i32, i32
  }
  func.func @transform_5(%arg0: i32) -> (i32, i32) {
    %c0_i32 = arith.constant 0 : i32
    %c0_i32_0 = arith.constant 0 : i32
    return %arg0, %c0_i32 : i32, i32
  }
}

</mosaic_0001>

<bundles_post_ra>
// kernel: mul.19
= control target key start
LH: loop header
LB: loop body
LE: loop exit
PB: predicated region body
PF: predicated region fallthrough
CT: control target
= control target key end

     0   :  { %s37_s8 = smov 8   ;;  %s38_s9 = smov 16   ;;  %vm7_vm0 = vcmask 64512   ;;  %vm13_vm1 = vcmask 261312   ;;  %vm19_vm2 = vcmask 195712   ;;  %vm25_vm3 = vcmask 130112   ;;  %s55_s0 = inlined_call_operand.vmem [shape: f32[4,8], index: 0, kind: input, shape index: {}]   ;;  %s56_s1 = inlined_call_operand.vmem [shape: f32[32], index: 1, kind: output, shape index: {}]  }
   0x1   :  { %v4_v0 = vld [vmem:[%s55_s0] sm:$0xf]  ;;  %s36_s0 = smov 24  }
   0x2   :  { %5 = vst [vmem:[#allocation1] sm:$0xf] %v4_v0 }
   0x9   :  { %v10_v1 = vld [vmem:[#allocation1 + $0x3] sm:$0x1]   ;;  %v22_v2 = vld [vmem:[#allocation1 + $0x1] sm:$0x1]   ;;  %v16_v3 = vld [vmem:[#allocation1 + $0x2] sm:$0x1]  }
   0xa   :  { %11 = vrot.lane.b32.xlu0 %v10_v1, %s36_s0  ;;  %23 = vrot.lane.b32.xlu1 %v22_v2, %s37_s8  ;;  %v6_v4 = vld [vmem:[#allocation1] sm:$0x1]  }
   0xb   :  { %8 = vst.msk [vmem:[#allocation0] sm:$0x1] %vm7_vm0, %v6_v4  }
  0x12   :  { %17 = vrot.lane.b32.xlu0 %v16_v3, %s38_s9 }
  0x7c   :  { %v12_v5 = vpop.permute.xlu0 %11   ;;  %v24_v6 = vpop.permute.xlu1 %23  }
  0x7d   :  { %14 = vst.msk [vmem:[#allocation0] sm:$0x1] %vm13_vm1, %v12_v5  }
  0x84   :  { %v18_v7 = vpop.permute.xlu0 %17  }
  0x85   :  { %20 = vst.msk [vmem:[#allocation0] sm:$0x1] %vm19_vm2, %v18_v7  }
  0x86   :  { %26 = vst.msk [vmem:[#allocation0] sm:$0x1] %vm25_vm3, %v24_v6  }
  0x8d   :  { %v29_v8 = vld [vmem:[#allocation0] sm:$0x1] }
  0x8e   :  { %32 = vst [vmem:[%s56_s1] sm:$0x1] %v29_v8 }

// kernel: context_attention.1
= control target key start
LH: loop header
LB: loop body
LE: loop exit
PB: predicated region body
PF: predicated region fallthrough
CT: control target
= control target key end

     0   :  { %10 = vsyncpa [#allocation3], 0  ;;  %s4397_s0 = inlined_call_operand.vmem [shape: f32[16,8,32], index: 0, kind: input, shape index: {}]   ;;  %s4398_s1 = inlined_call_operand.vmem [shape: f32[32,32], index: 1, kind: input, shape index: {}]   ;;  %s4399_s2 = inlined_call_operand.vmem [shape: f32[1,32], index: 2, kind: input, shape index: {}]   ;;  %s4400_s3 = inlined_call_operand.vmem [shape: f32[32,4], index: 3, kind: input, shape index: {}]   ;;  %s4401_s4 = inlined_call_operand.vmem [shape: f32[4,32], index: 4, kind: input, shape index: {}]   ;;  %s4402_s5 = inlined_call_operand.hbm [shape: f32[16,32], index: 5, kind: output, shape index: {}]  }
   0x1   :  { %12 = vsyncpa [#allocation3 + $0x1], 0  ;;  %s2999_s18 = smov 0   ;;  %s3001_s19 = smov 0  }
   0x2   :  { %s3003_s20 = smov 0   ;;  %s3005_s21 = smov 0  }
   0x3 LB: > { %s2664_s22 = sadd.s32 4294967295, %s2966_s21   ;;  %s2665_s23 = sadd.s32 4294967294, %s2966_s21   ;;  %s2966_s21 = sphi %s3005_s21, %s4491_s21   ;;  %s2962_s20 = sphi %s3003_s20, %s4490_s20   ;;  %s2958_s19 = sphi %s3001_s19, %s4489_s19   ;;  %s2954_s18 = sphi %s2999_s18, %s4488_s18  }
   0x4   : > { %s3022_s24 = sadd.s32 1, %s2966_s21   ;;  %s135_s25 = sadd.s32 1, %s2962_s20 }
   0x5   : > { %s132_s26 = ssub.s32 %s2966_s21, %s3022_s24  ;;  %p145_p0 = scmp.ne.s32.totalorder %s2962_s20, %s2958_s19 }
   0x6   : > { %p133_p1 = scmp.eq.s32.totalorder %s132_s26, 0  ;;  %p146_p2 = scmp.eq.s32.totalorder %s2664_s22, 1 }
   0x7   : > { %p151_p3 = scmp.ne.s32.totalorder %s2958_s19, %s2954_s18  ;;  %p152_p4 = scmp.eq.s32.totalorder %s2665_s23, 1 }
   0x8   : > { %s3032_s27 = scalar_select %p133_p1, %s2962_s20, %s135_s25  }
   0x9   : > { %p3034_p5 = por %p146_p2, %p145_p0  ;;  %p3038_p6 = por %p152_p4, %p151_p3 }
   0xa   : > { %p2668_p7 = scmp.ge.s32.totalorder %s2966_s21, 1  ;;  %p191_p8 = scmp.lt.s32.totalorder %s2966_s21, 3 }
   0xc   : > { %p192_p9 = pnand %p2668_p7, %p191_p8 }
   0xe   : > { %195 = sbr.rel (%p192_p9) target bundleno = 1469 (0x5bd), region = 40 }
  0x13   : > { %v236_v0 = vld [vmem:[%s4398_s1 + $0x18] sm:$0xff]  ;;  %v235_v1 = vld [vmem:[%s4398_s1 + $0x10] sm:$0xff]  ;;  %s3050_s9 = sshll.u32 %s2664_s22, 3  ;;  %v234_v2 = vld [vmem:[%s4398_s1 + $0x8] sm:$0xff]  ;;  %vm4405_vm0 = vcmask 261120   ;;  %v697_v57 = vlaneseq  ;;  %vm1146_vm9 = vcmask 1041409  }
  0x14   : > { %278 = vmatpush.msra.mxu0 %v236_v0  ;;  %2700 = vmatpush.msra.mxu2 %v236_v0  ;;  %p220_p10 = scmp.lt.s32.totalorder %s3050_s9, 15  ;;  %v233_v3 = vld [vmem:[%s4398_s1] sm:$0xff]  ;;  %v318_v12 = vld [vmem:[%s4400_s3 + $0x18] sm:$0xff]  ;;  %v317_v13 = vld [vmem:[%s4400_s3 + $0x10] sm:$0xff]  ;;  %vm1148_vm10 = vcmask 1042434   ;;  %vm4406_vm11 = vcmask 1043459   ;;  %s2601_s23 = scalar_lea.hbm %s4402_s5, %s3050_s9 }
  0x15   : > { %355 = vmatpush.msra.mxu1 %v318_v12  ;;  %2704 = vmatpush.msra.mxu3 %v318_v12  ;;  %v316_v14 = vld [vmem:[%s4400_s3 + $0x8] sm:$0xff]  ;;  %v315_v15 = vld [vmem:[%s4400_s3] sm:$0xff]  ;;  %v698_v58 = vshrl.u32 %v697_v57, 7  ;;  %vm1181_vm12 = vcmask 60416   ;;  %s2605_s30 = sshll.u32 %s2601_s23, 4  ;;  %s2924_s11 = scalar_lea.hbm %s4402_s5, 16  ;;  %s2606_s30 = int_to_ptr.hbm [resolvable:$true] %s2605_s30 }
  0x16   : > { %279 = vmatpush.msra.mxu0 %v235_v1  ;;  %2701 = vmatpush.msra.mxu2 %v235_v1  ;;  %s221_s12 = scalar_select %p220_p10, %s3050_s9, 15  ;;  %v2755_v16 = vld [vmem:[%s4399_s2] ss:$0 sm:$0xff] }
  0x17   : > { %356 = vmatpush.msra.mxu1 %v317_v13  ;;  %2705 = vmatpush.msra.mxu3 %v317_v13  ;;  %s2918_s6 = sshra.s32 %s2606_s30, 4  ;;  %s2919_s6 = int_to_ptr.hbm [resolvable:$true] %s2918_s6 }
  0x18   : > { %280 = vmatpush.msra.mxu0 %v234_v2  ;;  %s2671_s15 = sshll.u32 %s221_s12, 3  ;;  %2702 = vmatpush.msra.mxu2 %v234_v2  ;;  %s2920_s7 = scalar_lea.hbm %s2919_s6, 8 }
  0x19   : > { %s3063_s22 = scalar_lea.vmem %s4397_s0, %s2671_s15  ;;  %357 = vmatpush.msra.mxu1 %v316_v14  ;;  %2706 = vmatpush.msra.mxu3 %v316_v14  ;;  %s216_s15 = sand.u32 1, %s2958_s19  }
  0x1a   : > { %281 = vmatpush.msra.mxu0 %v233_v3  ;;  %v3066_v4 = vld [vmem:[%s3063_s22] sm:$0xff]  ;;  %2703 = vmatpush.msra.mxu2 %v233_v3  ;;  %v3069_v5 = vld [vmem:[%s3063_s22 + $0x30] sm:$0xff]  ;;  %v226_v7 = vld [vmem:[%s3063_s22 + $0x8] sm:$0xff]  ;;  %s4357_s16 = sshll.u32 %s216_s15, 3  ;;  %s2591_s9 = scalar_lea.sflag [#allocation3], %s216_s15 }
  0x1b   : > { %2672 = vmatmul.msk.f32.vlgmr.msra.gmra.mxu0 %vm4405_vm0, %v3066_v4  ;;  %2678 = vmatmul.msk.f32.vlgmr.msra.gmra.mxu2 %vm4405_vm0, %v3069_v5  ;;  %v227_v6 = vld [vmem:[%s3063_s22 + $0x10] sm:$0xff]  ;;  %v232_v8 = vld [vmem:[%s3063_s22 + $0x38] sm:$0xff]  ;;  %v229_v10 = vld [vmem:[%s3063_s22 + $0x20] sm:$0xff]  ;;  %v643_v31 = vsel %vm4405_vm0, %v226_v7, 0.0  ;;  %v658_v43 = vsel %vm4405_vm0, %v3069_v5, 0.0  ;;  %v640_v47 = vsel %vm4405_vm0, %v3066_v4, 0.0  ;;  %p2921_p11 = scmp.ne.s32.totalorder %s2919_s6, %s2920_s7  ;;  %p2925_p0 = scmp.lt.s32.totalorder %s2919_s6, %s4402_s5 }
  0x1c   : > { %2183 = vmatpush.msrb.mxu2 %v3066_v4  ;;  %v228_v9 = vld [vmem:[%s3063_s22 + $0x18] sm:$0xff]  ;;  %v3087_v11 = vld [vmem:[%s3063_s22 + $0x28] sm:$0xff]  ;;  %358 = vmatpush.msra.mxu1 %v315_v15  ;;  %v646_v30 = vsel %vm4405_vm0, %v227_v6, 0.0  ;;  %v661_v35 = vsel %vm4405_vm0, %v232_v8, 0.0  ;;  %v652_v39 = vsel %vm4405_vm0, %v229_v10, 0.0  ;;  %s218_s25 = scalar_lea.vmem [#allocation2], %s4357_s16  ;;  %p2926_p1 = scmp.lt.s32.totalorder %s2924_s11, %s2920_s7 }
  0x1d   : > { %2707 = vmatpush.msra.mxu3 %v315_v15  ;;  %647 = vadd.xlane.f32.xlu1 %v646_v30  ;;  %v649_v34 = vsel %vm4405_vm0, %v228_v9, 0.0  ;;  %v655_v48 = vsel %vm4405_vm0, %v3087_v11, 0.0  ;;  %s2603_s26 = sshll.u32 %s218_s25, 4  ;;  %p2922_p12 = pnand %p2921_p11, %p3034_p5  ;;  %s2604_s26 = int_to_ptr.vmem [resolvable:$true] %s2603_s26 }
  0x1e   : > { %2273 = vmatpush.msra.mxu2 %v227_v6  ;;  %644 = vadd.xlane.f32.xlu0 %v643_v31  ;;  %p2927_p2 = por %p2926_p1, %p2925_p0 }
  0x1f   : > { %2228 = vmatpush.msrb.mxu3 %v226_v7  ;;  %641 = vadd.xlane.f32.xlu2 %v640_v47  ;;  %p2923_p13 = pneg %p2922_p12 }
  0x21   : > { %p2928_p3 = pnand %p2927_p2, %p2923_p13 }
  0x23   : > { %2673 = vmatmul.msk.f32.gmra.mxu0 %vm4405_vm0, %v226_v7  ;;  %2679 = vmatmul.msk.f32.gmra.mxu2 %vm4405_vm0, %v232_v8 }
  0x25   : > { %650 = vadd.xlane.f32.xlu1 %v649_v34 }
  0x26   : > { %662 = vadd.xlane.f32.xlu0 %v661_v35 }
  0x27   : > { %656 = vadd.xlane.f32.xlu2 %v655_v48 }
  0x2b   : > { %2674 = vmatmul.msk.f32.gmra.mxu0 %vm4405_vm0, %v227_v6 }
  0x2d   : > { %653 = vadd.xlane.f32.xlu1 %v652_v39 }
  0x33   : > { %2675 = vmatmul.msk.f32.gmra.mxu0 %vm4405_vm0, %v228_v9 }
  0x35   : > { %659 = vadd.xlane.f32.xlu1 %v658_v43 }
  0x3b   : > { %2676 = vmatmul.msk.f32.gmra.mxu0 %vm4405_vm0, %v229_v10 }
  0x43   : > { %2677 = vmatmul.msk.f32.gmra.mxu0 %vm4405_vm0, %v3087_v11 }
  0x90   : > { %v3126_v59 = vpop.xlane.xlu1 %647 }
  0x91   : > { %v3128_v60 = vpop.xlane.xlu0 %644  ;;  %vm666_vm4 = vcmp.eq.f32.partialorder %v3126_v59, 0.0 }
  0x92   : > { %vm665_vm2 = vcmp.eq.f32.partialorder %v3128_v60, 0.0 }
  0x98   : > { %v283_v17 = vpop.f32.mrf.mxu0  ;;  %v3130_v61 = vpop.xlane.xlu1 %650 }
  0x99   : > { %v284_v18 = vadd.f32 %v2755_v16, %v283_v17  ;;  %v3132_v62 = vpop.xlane.xlu0 %662  ;;  %v3138_v17 = vpop.xlane.xlu2 %641  ;;  %vm667_vm6 = vcmp.eq.f32.partialorder %v3130_v61, 0.0 }
  0x9a   : > { %vm664_vm1 = vcmp.eq.f32.partialorder %v3138_v17, 0.0  ;;  %vm671_vm5 = vcmp.eq.f32.partialorder %v3132_v62, 0.0 }
  0x9b   : > { %2756 = vtanh.f32 %v284_v18 }
  0x9e   : > { %v301_v19 = vpop.f32.mrf.mxu2 }
  0x9f   : > { %v302_v20 = vadd.f32 %v2755_v16, %v301_v19 }
  0xa0   : > { %v286_v21 = vpop.f32.mrf.mxu0  ;;  %v3134_v3 = vpop.xlane.xlu1 %653 }
  0xa1   : > { %v2757_v22 = vpop.eup %2756  ;;  %v287_v23 = vadd.f32 %v2755_v16, %v286_v21  ;;  %2758 = vtanh.f32 %v302_v20  ;;  %vm668_vm7 = vcmp.eq.f32.partialorder %v3134_v3, 0.0 }
  0xa2   : > { %2680 = vmatmul.msk.f32.vlgmr.msra.gmra.mxu1 %vm4405_vm0, %v2757_v22 }
  0xa3   : > { %2760 = vtanh.f32 %v287_v23  ;;  %v3140_v23 = vpop.xlane.xlu2 %656 }
  0xa4   : > { %vm669_vm8 = vcmp.eq.f32.partialorder %v3140_v23, 0.0 }
  0xa6   : > { %v304_v24 = vpop.f32.mrf.mxu2 }
  0xa7   : > { %v2759_v25 = vpop.eup %2758  ;;  %v305_v26 = vadd.f32 %v2755_v16, %v304_v24 }
  0xa8   : > { %2686 = vmatmul.msk.f32.vlgmr.msra.gmra.mxu3 %vm4405_vm0, %v2759_v25  ;;  %v289_v27 = vpop.f32.mrf.mxu0  ;;  %v3136_v7 = vpop.xlane.xlu1 %659 }
  0xa9   : > { %v2761_v28 = vpop.eup %2760  ;;  %v290_v29 = vadd.f32 %v2755_v16, %v289_v27  ;;  %2762 = vtanh.f32 %v305_v26  ;;  %2318 = vmatpush.msra.mxu3 %v228_v9  ;;  %vm670_vm3 = vcmp.eq.f32.partialorder %v3136_v7, 0.0 }
  0xaa   : > { %2681 = vmatmul.msk.f32.gmra.mxu1 %vm4405_vm0, %v2761_v28 }
  0xab   : > { %2764 = vtanh.f32 %v290_v29 }
  0xaf   : > { %v2763_v32 = vpop.eup %2762 }
  0xb0   : > { %2687 = vmatmul.msk.f32.gmra.mxu3 %vm4405_vm0, %v2763_v32  ;;  %v292_v33 = vpop.f32.mrf.mxu0 }
  0xb1   : > { %v2765_v36 = vpop.eup %2764  ;;  %v293_v37 = vadd.f32 %v2755_v16, %v292_v33 }
  0xb2   : > { %2682 = vmatmul.msk.f32.gmra.mxu1 %vm4405_vm0, %v2765_v36 }
  0xb3   : > { %2766 = vtanh.f32 %v293_v37 }
  0xb8   : > { %v295_v38 = vpop.f32.mrf.mxu0 }
  0xb9   : > { %v2767_v40 = vpop.eup %2766  ;;  %v296_v41 = vadd.f32 %v2755_v16, %v295_v38 }
  0xba   : > { %2683 = vmatmul.msk.f32.gmra.mxu1 %vm4405_vm0, %v2767_v40 }
  0xbb   : > { %2768 = vtanh.f32 %v296_v41 }
  0xc0   : > { %v298_v42 = vpop.f32.mrf.mxu0 }
  0xc1   : > { %v2769_v44 = vpop.eup %2768  ;;  %v299_v45 = vadd.f32 %v2755_v16, %v298_v42  ;;  %v2968_v42 = vmov 0  }
  0xc2   : > { %2684 = vmatmul.msk.f32.gmra.mxu1 %vm4405_vm0, %v2769_v44 }
  0xc3   : > { %2770 = vtanh.f32 %v299_v45 }
  0xc9   : > { %v2771_v46 = vpop.eup %2770 }
  0xca   : > { %2685 = vmatmul.msk.f32.gmra.mxu1 %vm4405_vm0, %v2771_v46 }
 0x11f   : > { %v360_v49 = vpop.f32.mrf.mxu1 }
 0x120   : > { %384 = vxpose.xlu0.b32.start.end [1/1] (short) (narrow) %v360_v49, 8 }
 0x127   : > { %v363_v50 = vpop.f32.mrf.mxu1 }
 0x128   : > { %416 = vxpose.xlu0.b32.start.end [1/1] (short) (narrow) %v363_v50, 8 }
 0x12b   : > { %v378_v51 = vpop.f32.mrf.mxu3 }
 0x12f   : > { %v366_v52 = vpop.f32.mrf.mxu1 }
 0x130   : > { %576 = vxpose.xlu0.b32.start.end [1/1] (short) (narrow) %v378_v51, 8  ;;  %448 = vxpose.xlu1.b32.start.end [1/1] (short) (narrow) %v366_v52, 8 }
 0x133   : > { %v381_v53 = vpop.f32.mrf.mxu3 }
 0x137   : > { %v369_v54 = vpop.f32.mrf.mxu1 }
 0x138   : > { %608 = vxpose.xlu1.b32.start.end [1/1] (short) (narrow) %v381_v53, 8 }
 0x13f   : > { %v372_v55 = vpop.f32.mrf.mxu1 }
 0x140   : > { %480 = vxpose.xlu1.b32.start.end [1/1] (short) (narrow) %v369_v54, 8  ;;  %512 = vxpose.xlu2.b32.start.end [1/1] (short) (narrow) %v372_v55, 8 }
 0x147   : > { %v375_v56 = vpop.f32.mrf.mxu1 }
 0x148   : > { %544 = vxpose.xlu2.b32.start.end [1/1] (short) (narrow) %v375_v56, 8 }
 0x193   : > { %2750 = vset.pattern.permute.xlu1 %v698_v58 }
 0x197   : > { %2751 = vset.pattern.permute.xlu0 %v698_v58 }
 0x1aa   : > { %2749 = vset.pattern.permute.xlu2 %v698_v58 }
 0x1c4   : > { %v400_v63 = vpop.trf.xlu0 }
 0x1c5   : > { %v710_v0 = vperm.slane %v400_v63, 2  ;;  %v703_v1 = vperm.slane %v400_v63, 1  ;;  %v696_v2 = vperm.slane %v400_v63, 0  ;;  %v717_v6 = vperm.slane %v400_v63, 3 }
 0x1c7   : > { %715 = vperm.xlu0 %2751, %v710_v0   ;;  %708 = vperm.xlu1 %2750, %v703_v1  }
 0x1c8   : > { %701 = vperm.xlu2 %2749, %v696_v2  }
 0x1cc   : > { %v432_v4 = vpop.trf.xlu0 }
 0x1cd   : > { %v724_v5 = vperm.slane %v432_v4, 0  ;;  %v738_v10 = vperm.slane %v432_v4, 2  ;;  %v731_v11 = vperm.slane %v432_v4, 1  ;;  %v745_v15 = vperm.slane %v432_v4, 3 }
 0x1cf   : > { %729 = vperm.xlu1 %2750, %v724_v5  }
 0x1d0   : > { %722 = vperm.xlu2 %2749, %v717_v6  }
 0x1d4   : > { %v592_v8 = vpop.trf.xlu0  ;;  %v464_v12 = vpop.trf.xlu1 }
 0x1d5   : > { %v878_v9 = vperm.slane %v592_v8, 2  ;;  %v752_v13 = vperm.slane %v464_v12, 0  ;;  %v864_v14 = vperm.slane %v592_v8, 0  ;;  %v773_v16 = vperm.slane %v464_v12, 3 }
 0x1d6   : > { %v885_v18 = vperm.slane %v592_v8, 3  ;;  %v871_v19 = vperm.slane %v592_v8, 1  ;;  %v759_v22 = vperm.slane %v464_v12, 1  ;;  %v766_v24 = vperm.slane %v464_v12, 2 }
 0x1d7   : > { %883 = vperm.xlu0 %2751, %v878_v9   ;;  %743 = vperm.xlu1 %2750, %v738_v10  }
 0x1d8   : > { %736 = vperm.xlu2 %2749, %v731_v11  }
 0x1d9   : > { %v528_v29 = vpop.trf.xlu2 }
 0x1da   : > { %v815_v31 = vperm.slane %v528_v29, 1  ;;  %v822_v37 = vperm.slane %v528_v29, 2  ;;  %v808_v39 = vperm.slane %v528_v29, 0  ;;  %v829_v41 = vperm.slane %v528_v29, 3 }
 0x1dc   : > { %v624_v20 = vpop.trf.xlu1 }
 0x1dd   : > { %v899_v21 = vperm.slane %v624_v20, 1  ;;  %v906_v26 = vperm.slane %v624_v20, 2  ;;  %v892_v28 = vperm.slane %v624_v20, 0  ;;  %v913_v32 = vperm.slane %v624_v20, 3 }
 0x1df   : > { %757 = vperm.xlu0 %2751, %v752_v13   ;;  %869 = vperm.xlu1 %2750, %v864_v14  }
 0x1e0   : > { %750 = vperm.xlu2 %2749, %v745_v15  }
 0x1e1   : > { %v560_v33 = vpop.trf.xlu2 }
 0x1e2   : > { %v836_v34 = vperm.slane %v560_v33, 0  ;;  %v857_v38 = vperm.slane %v560_v33, 3  ;;  %v843_v40 = vperm.slane %v560_v33, 1  ;;  %v850_v43 = vperm.slane %v560_v33, 2 }
 0x1e4   : > { %v496_v25 = vpop.trf.xlu1 }
 0x1e5   : > { %v794_v27 = vperm.slane %v496_v25, 2  ;;  %v780_v30 = vperm.slane %v496_v25, 0  ;;  %v801_v35 = vperm.slane %v496_v25, 3  ;;  %v787_v36 = vperm.slane %v496_v25, 1 }
 0x1e7   : > { %778 = vperm.xlu0 %2751, %v773_v16   ;;  %890 = vperm.xlu1 %2750, %v885_v18  }
 0x1e8   : > { %876 = vperm.xlu2 %2749, %v871_v19  }
 0x1ef   : > { %904 = vperm.xlu0 %2751, %v899_v21   ;;  %764 = vperm.xlu1 %2750, %v759_v22  }
 0x1f0   : > { %771 = vperm.xlu2 %2749, %v766_v24  }
 0x1f7   : > { %911 = vperm.xlu1 %2750, %v906_v26   ;;  %799 = vperm.xlu0 %2751, %v794_v27  }
 0x1f8   : > { %897 = vperm.xlu2 %2749, %v892_v28  }
 0x1ff   : > { %785 = vperm.xlu1 %2750, %v780_v30   ;;  %820 = vperm.xlu0 %2751, %v815_v31  }
 0x200   : > { %918 = vperm.xlu2 %2749, %v913_v32  }
 0x207   : > { %806 = vperm.xlu1 %2750, %v801_v35   ;;  %841 = vperm.xlu0 %2751, %v836_v34  }
 0x208   : > { %792 = vperm.xlu2 %2749, %v787_v36  }
 0x20f   : > { %827 = vperm.xlu1 %2750, %v822_v37   ;;  %862 = vperm.xlu0 %2751, %v857_v38  }
 0x210   : > { %813 = vperm.xlu2 %2749, %v808_v39  }
 0x217   : > { %848 = vperm.xlu1 %2750, %v843_v40   ;;  %2752 = vset.pattern.permute.xlu0 %v2968_v42 }
 0x218   : > { %834 = vperm.xlu2 %2749, %v829_v41  }
 0x21f   : > { %2753 = vset.pattern.permute.xlu1 %v2968_v42 }
 0x220   : > { %855 = vperm.xlu2 %2749, %v850_v43  }
 0x222   : > { %v702_v44 = vpop.permute.xlu2 %701 }
 0x223   : > { %v3145_v45 = vsel %vm664_vm1, -1e+10, %v702_v44 }
 0x224   : > { %1017 = vperm.xlu0 %2752, %v3145_v45  }
 0x228   : > { %2754 = vset.pattern.permute.xlu2 %v2968_v42 }
 0x22a   : > { %v723_v46 = vpop.permute.xlu2 %722 }
 0x22b   : > { %v3166_v55 = vsel %vm664_vm1, -1e+10, %v723_v46 }
 0x232   : > { %v737_v47 = vpop.permute.xlu2 %736 }
 0x233   : > { %v3151_v48 = vsel %vm665_vm2, -1e+10, %v737_v47 }
 0x234   : > { %1032 = vperm.xlu0 %2752, %v3151_v48  }
 0x239   : > { %v716_v49 = vpop.permute.xlu0 %715  ;;  %v709_v50 = vpop.permute.xlu1 %708 }
 0x23a   : > { %v3156_v51 = vsel %vm664_vm1, -1e+10, %v716_v49  ;;  %v3160_v52 = vsel %vm664_vm1, -1e+10, %v709_v50  ;;  %v751_v53 = vpop.permute.xlu2 %750 }
 0x23b   : > { %1023 = vperm.xlu2 %2754, %v3156_v51   ;;  %1020 = vperm.xlu1 %2753, %v3160_v52   ;;  %v3185_v4 = vsel %vm665_vm2, -1e+10, %v751_v53 }
 0x241   : > { %v730_v54 = vpop.permute.xlu1 %729 }
 0x242   : > { %v3170_v56 = vsel %vm665_vm2, -1e+10, %v730_v54  ;;  %v877_v58 = vpop.permute.xlu2 %876 }
 0x243   : > { %1029 = vperm.xlu2 %2754, %v3170_v56   ;;  %1026 = vperm.xlu1 %2753, %v3166_v55   ;;  %v3201_v10 = vsel %vm670_vm3, -1e+10, %v877_v58  ;;  %v3303_v58 = vand.u32 127, %v697_v57 }
 0x245   : > { %4412 = vst [vmem:[#allocation5_spill] sm:$0xff] %v3303_v58 }
 0x249   : > { %v884_v63 = vpop.permute.xlu0 %883  ;;  %v744_v0 = vpop.permute.xlu1 %743 }
 0x24a   : > { %v3177_v1 = vsel %vm670_vm3, -1e+10, %v884_v63  ;;  %v3181_v2 = vsel %vm665_vm2, -1e+10, %v744_v0  ;;  %v772_v5 = vpop.permute.xlu2 %771 }
 0x24b   : > { %1035 = vperm.xlu1 %2753, %v3181_v2   ;;  %1095 = vperm.xlu0 %2752, %v3177_v1   ;;  %v3216_v16 = vsel %vm666_vm4, -1e+10, %v772_v5 }
 0x24c   : > { %1038 = vperm.xlu2 %2754, %v3185_v4  }
 0x251   : > { %v758_v6 = vpop.permute.xlu0 %757  ;;  %v870_v8 = vpop.permute.xlu1 %869 }
 0x252   : > { %v3193_v9 = vsel %vm666_vm4, -1e+10, %v758_v6  ;;  %v3197_v60 = vsel %vm670_vm3, -1e+10, %v870_v8  ;;  %v898_v11 = vpop.permute.xlu2 %897 }
 0x253   : > { %1089 = vperm.xlu1 %2753, %v3197_v60   ;;  %1041 = vperm.xlu0 %2752, %v3193_v9   ;;  %v3228_v21 = vsel %vm671_vm5, -1e+10, %v898_v11 }
 0x254   : > { %1092 = vperm.xlu2 %2754, %v3201_v10  }
 0x259   : > { %v779_v12 = vpop.permute.xlu0 %778  ;;  %v891_v13 = vpop.permute.xlu1 %890 }
 0x25a   : > { %v3208_v14 = vsel %vm666_vm4, -1e+10, %v779_v12  ;;  %v3212_v15 = vsel %vm670_vm3, -1e+10, %v891_v13  ;;  %v919_v17 = vpop.permute.xlu2 %918 }
 0x25b   : > { %1098 = vperm.xlu1 %2753, %v3212_v15   ;;  %1050 = vperm.xlu0 %2752, %v3208_v14   ;;  %v3240_v26 = vsel %vm671_vm5, -1e+10, %v919_v17 }
 0x25c   : > { %1047 = vperm.xlu2 %2754, %v3216_v16  }
 0x261   : > { %v905_v18 = vpop.permute.xlu0 %904  ;;  %v765_v19 = vpop.permute.xlu1 %764 }
 0x262   : > { %v3222_v20 = vsel %vm671_vm5, -1e+10, %v905_v18  ;;  %v3226_v7 = vsel %vm666_vm4, -1e+10, %v765_v19  ;;  %v793_v24 = vpop.permute.xlu2 %792 }
 0x263   : > { %1044 = vperm.xlu1 %2753, %v3226_v7   ;;  %1104 = vperm.xlu0 %2752, %v3222_v20   ;;  %v3256_v31 = vsel %vm667_vm6, -1e+10, %v793_v24 }
 0x264   : > { %1101 = vperm.xlu2 %2754, %v3228_v21  }
 0x269   : > { %v800_v22 = vpop.permute.xlu0 %799  ;;  %v912_v62 = vpop.permute.xlu1 %911 }
 0x26a   : > { %v3236_v25 = vsel %vm667_vm6, -1e+10, %v800_v22  ;;  %v3238_v59 = vsel %vm671_vm5, -1e+10, %v912_v62  ;;  %v814_v32 = vpop.permute.xlu2 %813 }
 0x26b   : > { %1107 = vperm.xlu1 %2753, %v3238_v59   ;;  %1059 = vperm.xlu0 %2752, %v3236_v25   ;;  %v3272_v37 = vsel %vm668_vm7, -1e+10, %v814_v32 }
 0x26c   : > { %1110 = vperm.xlu2 %2754, %v3240_v26  }
 0x271   : > { %v786_v27 = vpop.permute.xlu1 %785  ;;  %v821_v28 = vpop.permute.xlu0 %820 }
 0x272   : > { %v3248_v29 = vsel %vm667_vm6, -1e+10, %v786_v27  ;;  %v3252_v30 = vsel %vm668_vm7, -1e+10, %v821_v28  ;;  %v835_v38 = vpop.permute.xlu2 %834 }
 0x273   : > { %1053 = vperm.xlu1 %2753, %v3248_v29   ;;  %1068 = vperm.xlu0 %2752, %v3252_v30   ;;  %v3287_v42 = vsel %vm668_vm7, -1e+10, %v835_v38 }
 0x274   : > { %1056 = vperm.xlu2 %2754, %v3256_v31  }
 0x279   : > { %v807_v33 = vpop.permute.xlu1 %806  ;;  %v842_v34 = vpop.permute.xlu0 %841 }
 0x27a   : > { %v3264_v35 = vsel %vm667_vm6, -1e+10, %v807_v33  ;;  %v3268_v36 = vsel %vm669_vm8, -1e+10, %v842_v34  ;;  %v856_v43 = vpop.permute.xlu2 %855 }
 0x27b   : > { %1062 = vperm.xlu1 %2753, %v3264_v35   ;;  %1077 = vperm.xlu0 %2752, %v3268_v36   ;;  %v3298_v47 = vsel %vm669_vm8, -1e+10, %v856_v43 }
 0x27c   : > { %1065 = vperm.xlu2 %2754, %v3272_v37  }
 0x281   : > { %v828_v39 = vpop.permute.xlu1 %827  ;;  %v863_v40 = vpop.permute.xlu0 %862 }
 0x282   : > { %v3279_v61 = vsel %vm668_vm7, -1e+10, %v828_v39  ;;  %v3283_v41 = vsel %vm669_vm8, -1e+10, %v863_v40 }
 0x283   : > { %1071 = vperm.xlu1 %2753, %v3279_v61   ;;  %1086 = vperm.xlu0 %2752, %v3283_v41  }
 0x284   : > { %1074 = vperm.xlu2 %2754, %v3287_v42  }
 0x289   : > { %v849_v44 = vpop.permute.xlu1 %848 }
 0x28a   : > { %v3294_v46 = vsel %vm669_vm8, -1e+10, %v849_v44 }
 0x28b   : > { %1080 = vperm.xlu1 %2753, %v3294_v46  }
 0x28c   : > { %1083 = vperm.xlu2 %2754, %v3298_v47  }
 0x295   : > { %v1024_v3 = vpop.permute.xlu2 %1023 }
 0x296   : > { %v1018_v53 = vpop.permute.xlu0 %1017  ;;  %v1116_v5 = vperm.slane %v1024_v3, %v3303_v58 }
 0x297   : > { %v1114_v0 = vperm.slane %v1018_v53, %v3303_v58 }
 0x29d   : > { %v1030_v49 = vpop.permute.xlu2 %1029 }
 0x29e   : > { %v1118_v19 = vperm.slane %v1030_v49, %v3303_v58 }
 0x2a6   : > { %v1039_v50 = vpop.permute.xlu2 %1038  ;;  %v1033_v6 = vpop.permute.xlu0 %1032 }
 0x2a7   : > { %v1119_v18 = vperm.slane %v1033_v6, %v3303_v58  ;;  %v1121_v28 = vperm.slane %v1039_v50, %v3303_v58 }
 0x2a9   : > { %v1152_v27 = vsel %vm1146_vm9, %v1119_v18, %v1118_v19 }
 0x2ad   : > { %v1021_v54 = vpop.permute.xlu1 %1020 }
 0x2ae   : > { %v1115_v63 = vperm.slane %v1021_v54, %v3303_v58  ;;  %v1093_v11 = vpop.permute.xlu2 %1092 }
 0x2af   : > { %v1139_v44 = vperm.slane %v1093_v11, %v3303_v58 }
 0x2b0   : > { %v1147_v23 = vsel %vm1146_vm9, %v1115_v63, %v1114_v0 }
 0x2b1   : > { %v1149_v57 = vsel %vm1148_vm10, %v1116_v5, %v1147_v23 }
 0x2b5   : > { %v1027_v8 = vpop.permute.xlu1 %1026 }
 0x2b6   : > { %v1117_v12 = vperm.slane %v1027_v8, %v3303_v58  ;;  %v1048_v32 = vpop.permute.xlu2 %1047 }
 0x2b8   : > { %v1151_v13 = vsel %vm4406_vm11, %v1117_v12, %v1149_v57 }
 0x2b9   : > { %v1182_v17 = vsel %vm1181_vm12, %v1151_v13, -inf  ;;  %v1124_v13 = vperm.slane %v1048_v32, %v3303_v58 }
 0x2ba   : > { %1183 = vmax.xlane.f32.xlu0 %v1182_v17 }
 0x2bd   : > { %v1036_v22 = vpop.permute.xlu1 %1035  ;;  %v1096_v62 = vpop.permute.xlu0 %1095 }
 0x2be   : > { %v1120_v24 = vperm.slane %v1036_v22, %v3303_v58  ;;  %v1102_v3 = vpop.permute.xlu2 %1101  ;;  %v1140_v53 = vperm.slane %v1096_v62, %v3303_v58 }
 0x2c0   : > { %v1153_v33 = vsel %vm1148_vm10, %v1120_v24, %v1152_v27  ;;  %v1142_v27 = vperm.slane %v1102_v3, %v3303_v58 }
 0x2c1   : > { %v1154_v34 = vsel %vm4406_vm11, %v1121_v28, %v1153_v33 }
 0x2c2   : > { %v1185_v38 = vsel %vm1181_vm12, %v1154_v34, -inf }
 0x2c3   : > { %1186 = vmax.xlane.f32.xlu1 %v1185_v38 }
 0x2c5   : > { %v1090_v39 = vpop.permute.xlu1 %1089  ;;  %v1042_v40 = vpop.permute.xlu0 %1041 }
 0x2c6   : > { %v1138_v43 = vperm.slane %v1090_v39, %v3303_v58  ;;  %v1111_v6 = vpop.permute.xlu2 %1110  ;;  %v1122_v11 = vperm.slane %v1042_v40, %v3303_v58 }
 0x2c7   : > { %v1145_v32 = vperm.slane %v1111_v6, %v3303_v58 }
 0x2c8   : > { %v1167_v49 = vsel %vm1146_vm9, %v1139_v44, %v1138_v43 }
 0x2c9   : > { %v1168_v0 = vsel %vm1148_vm10, %v1140_v53, %v1167_v49 }
 0x2cd   : > { %v1099_v50 = vpop.permute.xlu1 %1098  ;;  %v1051_v54 = vpop.permute.xlu0 %1050 }
 0x2ce   : > { %v1141_v63 = vperm.slane %v1099_v50, %v3303_v58  ;;  %v1125_v17 = vperm.slane %v1051_v54, %v3303_v58  ;;  %v1057_v33 = vpop.permute.xlu2 %1056 }
 0x2cf   : > { %v1127_v54 = vperm.slane %v1057_v33, %v3303_v58 }
 0x2d0   : > { %v1169_v23 = vsel %vm4406_vm11, %v1141_v63, %v1168_v0 }
 0x2d1   : > { %v1200_v5 = vsel %vm1181_vm12, %v1169_v23, -inf }
 0x2d2   : > { %1201 = vmax.xlane.f32.xlu2 %v1200_v5 }
 0x2d5   : > { %v1045_v8 = vpop.permute.xlu1 %1044  ;;  %v1105_v12 = vpop.permute.xlu0 %1104 }
 0x2d6   : > { %v1123_v57 = vperm.slane %v1045_v8, %v3303_v58  ;;  %v1143_v62 = vperm.slane %v1105_v12, %v3303_v58  ;;  %v1066_v53 = vpop.permute.xlu2 %1065 }
 0x2d8   : > { %v1155_v18 = vsel %vm1146_vm9, %v1123_v57, %v1122_v11  ;;  %v1170_v38 = vsel %vm1146_vm9, %v1143_v62, %v1142_v27 }
 0x2d9   : > { %v1156_v19 = vsel %vm1148_vm10, %v1124_v13, %v1155_v18 }
 0x2da   : > { %v1157_v22 = vsel %vm4406_vm11, %v1125_v17, %v1156_v19  ;;  %v1130_v17 = vperm.slane %v1066_v53, %v3303_v58 }
 0x2db   : > { %v1188_v24 = vsel %vm1181_vm12, %v1157_v22, -inf }
 0x2dc   : > { %1189 = vmax.xlane.f32.xlu2 %v1188_v24 }
 0x2dd   : > { %v1108_v28 = vpop.permute.xlu1 %1107  ;;  %v1060_v39 = vpop.permute.xlu0 %1059 }
 0x2de   : > { %v1144_v34 = vperm.slane %v1108_v28, %v3303_v58  ;;  %v1128_v0 = vperm.slane %v1060_v39, %v3303_v58  ;;  %v1075_v11 = vpop.permute.xlu2 %1074 }
 0x2df   : > { %v1133_v22 = vperm.slane %v1075_v11, %v3303_v58 }
 0x2e0   : > { %v1171_v40 = vsel %vm1148_vm10, %v1144_v34, %v1170_v38 }
 0x2e1   : > { %v1172_v43 = vsel %vm4406_vm11, %v1145_v32, %v1171_v40 }
 0x2e2   : > { %v1203_v44 = vsel %vm1181_vm12, %v1172_v43, -inf }
 0x2e3   : > { %1204 = vmax.xlane.f32.xlu0 %v1203_v44 }
 0x2e5   : > { %v1054_v49 = vpop.permute.xlu1 %1053  ;;  %v1069_v50 = vpop.permute.xlu0 %1068 }
 0x2e6   : > { %v1126_v3 = vperm.slane %v1054_v49, %v3303_v58  ;;  %v1131_v57 = vperm.slane %v1069_v50, %v3303_v58  ;;  %v1084_v33 = vpop.permute.xlu2 %1083 }
 0x2e7   : > { %v1136_v40 = vperm.slane %v1084_v33, %v3303_v58 }
 0x2e8   : > { %v1158_v63 = vsel %vm1146_vm9, %v1127_v54, %v1126_v3  ;;  %v1161_v62 = vsel %vm1146_vm9, %v1131_v57, %v1130_v17 }
 0x2e9   : > { %v1159_v6 = vsel %vm1148_vm10, %v1128_v0, %v1158_v63 }
 0x2ed   : > { %v1063_v23 = vpop.permute.xlu1 %1062  ;;  %v1078_v13 = vpop.permute.xlu0 %1077 }
 0x2ee   : > { %v1129_v5 = vperm.slane %v1063_v23, %v3303_v58  ;;  %v1134_v38 = vperm.slane %v1078_v13, %v3303_v58 }
 0x2f0   : > { %v1160_v8 = vsel %vm4406_vm11, %v1129_v5, %v1159_v6 }
 0x2f1   : > { %v1191_v12 = vsel %vm1181_vm12, %v1160_v8, -inf }
 0x2f2   : > { %1192 = vmax.xlane.f32.xlu2 %v1191_v12 }
 0x2f5   : > { %v1072_v18 = vpop.permute.xlu1 %1071  ;;  %v1087_v34 = vpop.permute.xlu0 %1086 }
 0x2f6   : > { %v1132_v19 = vperm.slane %v1072_v18, %v3303_v58  ;;  %v1137_v43 = vperm.slane %v1087_v34, %v3303_v58 }
 0x2f8   : > { %v1162_v24 = vsel %vm1148_vm10, %v1132_v19, %v1161_v62 }
 0x2f9   : > { %v1163_v27 = vsel %vm4406_vm11, %v1133_v22, %v1162_v24 }
 0x2fa   : > { %v1194_v28 = vsel %vm1181_vm12, %v1163_v27, -inf }
 0x2fb   : > { %1195 = vmax.xlane.f32.xlu0 %v1194_v28 }
 0x2fd   : > { %v1081_v32 = vpop.permute.xlu1 %1080 }
 0x2fe   : > { %v1135_v39 = vperm.slane %v1081_v32, %v3303_v58 }
 0x300   : > { %v1164_v44 = vsel %vm1146_vm9, %v1135_v39, %v1134_v38 }
 0x301   : > { %v1165_v49 = vsel %vm1148_vm10, %v1136_v40, %v1164_v44 }
 0x302   : > { %v1166_v53 = vsel %vm4406_vm11, %v1137_v43, %v1165_v49 }
 0x303   : > { %v1197_v3 = vsel %vm1181_vm12, %v1166_v53, -inf }
 0x304   : > { %1198 = vmax.xlane.f32.xlu1 %v1197_v3 }
 0x32d   : > { %v1184_v50 = vpop.xlane.xlu0 %1183 }
 0x32e   : > { %v1214_v54 = vperm.slane %v1184_v50, 0  ;;  %v1215_v63 = vperm.slane %v1184_v50, 1  ;;  %v1216_v0 = vperm.slane %v1184_v50, 2  ;;  %v1217_v23 = vperm.slane %v1184_v50, 3 }
 0x330   : > { %v1278_v5 = vsub.f32 %v3145_v45, %v1214_v54  ;;  %v1279_v6 = vsub.f32 %v3160_v52, %v1215_v63  ;;  %v1280_v8 = vsub.f32 %v3156_v51, %v1216_v0  ;;  %v1281_v13 = vsub.f32 %v3166_v55, %v1217_v23 }
 0x332   : > { %v1310_v12 = vmul.f32 1.442695, %v1278_v5  ;;  %v1312_v11 = vmul.f32 1.442695, %v1279_v6  ;;  %v1314_v57 = vmul.f32 1.442695, %v1280_v8 }
 0x333   : > { %v1316_v22 = vmul.f32 1.442695, %v1281_v13 }
 0x334   : > { %2772 = vpow2.f32 %v1310_v12 }
 0x335   : > { %2774 = vpow2.f32 %v1312_v11 }
 0x336   : > { %2776 = vpow2.f32 %v1314_v57  ;;  %v1187_v17 = vpop.xlane.xlu1 %1186 }
 0x337   : > { %v1218_v18 = vperm.slane %v1187_v17, 0  ;;  %v1219_v19 = vperm.slane %v1187_v17, 1  ;;  %v1220_v62 = vperm.slane %v1187_v17, 2  ;;  %v1221_v51 = vperm.slane %v1187_v17, 3 }
 0x338   : > { %2778 = vpow2.f32 %v1316_v22 }
 0x339   : > { %v1282_v24 = vsub.f32 %v3170_v56, %v1218_v18  ;;  %v1283_v45 = vsub.f32 %v3151_v48, %v1219_v19  ;;  %v1284_v34 = vsub.f32 %v3181_v2, %v1220_v62  ;;  %v1285_v48 = vsub.f32 %v3185_v4, %v1221_v51 }
 0x33a   : > { %v3375_v52 = vpop.eup %2772 }
 0x33b   : > { %v3377_v27 = vpop.eup %2774  ;;  %v1318_v28 = vmul.f32 1.442695, %v1282_v24  ;;  %v1320_v33 = vmul.f32 1.442695, %v1283_v45  ;;  %1407 = vperm.xlu1 %2753, %v3375_v52   ;;  %v1322_v56 = vmul.f32 1.442695, %v1284_v34 }
 0x33c   : > { %v3380_v55 = vpop.eup %2776  ;;  %1410 = vperm.xlu2 %2754, %v3377_v27   ;;  %v1324_v38 = vmul.f32 1.442695, %v1285_v48 }
 0x33d   : > { %2780 = vpow2.f32 %v1318_v28  ;;  %1413 = vperm.xlu0 %2752, %v3380_v55  }
 0x33e   : > { %2782 = vpow2.f32 %v1320_v33  ;;  %v3386_v32 = vpop.eup %2778 }
 0x33f   : > { %2784 = vpow2.f32 %v1322_v56 }
 0x340   : > { %2786 = vpow2.f32 %v1324_v38 }
 0x343   : > { %v3388_v39 = vpop.eup %2780  ;;  %1416 = vperm.xlu1 %2753, %v3386_v32  }
 0x344   : > { %v3391_v40 = vpop.eup %2782 }
 0x345   : > { %1422 = vperm.xlu2 %2754, %v3391_v40   ;;  %1419 = vperm.xlu0 %2752, %v3388_v39   ;;  %v1202_v2 = vpop.xlane.xlu2 %1201  ;;  %v3398_v54 = vpop.eup %2784 }
 0x346   : > { %v1238_v43 = vperm.slane %v1202_v2, 0  ;;  %v1239_v4 = vperm.slane %v1202_v2, 1  ;;  %v1240_v44 = vperm.slane %v1202_v2, 2  ;;  %v1241_v50 = vperm.slane %v1202_v2, 3  ;;  %v3401_v5 = vpop.eup %2786 }
 0x348   : > { %v1302_v49 = vsub.f32 %v3197_v60, %v1238_v43  ;;  %v1303_v53 = vsub.f32 %v3201_v10, %v1239_v4  ;;  %v1304_v3 = vsub.f32 %v3177_v1, %v1240_v44  ;;  %v1305_v60 = vsub.f32 %v3212_v15, %v1241_v50 }
 0x34a   : > { %v1358_v63 = vmul.f32 1.442695, %v1302_v49  ;;  %v1360_v0 = vmul.f32 1.442695, %v1303_v53  ;;  %v1362_v23 = vmul.f32 1.442695, %v1304_v3 }
 0x34b   : > { %1425 = vperm.xlu1 %2753, %v3398_v54   ;;  %v1364_v11 = vmul.f32 1.442695, %v1305_v60 }
 0x34c   : > { %2788 = vpow2.f32 %v1358_v63 }
 0x34d   : > { %2790 = vpow2.f32 %v1360_v0  ;;  %1428 = vperm.xlu0 %2752, %v3401_v5  }
 0x34e   : > { %2792 = vpow2.f32 %v1362_v23 }
 0x34f   : > { %v1190_v10 = vpop.xlane.xlu2 %1189  ;;  %2794 = vpow2.f32 %v1364_v11 }
 0x350   : > { %v1222_v6 = vperm.slane %v1190_v10, 0  ;;  %v1223_v1 = vperm.slane %v1190_v10, 1  ;;  %v1224_v8 = vperm.slane %v1190_v10, 2  ;;  %v1225_v28 = vperm.slane %v1190_v10, 3 }
 0x352   : > { %v3405_v12 = vpop.eup %2788  ;;  %v1287_v57 = vsub.f32 %v3226_v7, %v1223_v1  ;;  %v1288_v13 = vsub.f32 %v3216_v16, %v1224_v8  ;;  %v1286_v15 = vsub.f32 %v3193_v9, %v1222_v6  ;;  %v1289_v43 = vsub.f32 %v3208_v14, %v1225_v28 }
 0x353   : > { %v3409_v17 = vpop.eup %2790  ;;  %1479 = vperm.xlu1 %2753, %v3405_v12  }
 0x354   : > { %v3412_v18 = vpop.eup %2792  ;;  %v1328_v19 = vmul.f32 1.442695, %v1287_v57  ;;  %v1330_v22 = vmul.f32 1.442695, %v1288_v13  ;;  %v1326_v16 = vmul.f32 1.442695, %v1286_v15 }
 0x355   : > { %1485 = vperm.xlu2 %2754, %v3412_v18   ;;  %1482 = vperm.xlu0 %2752, %v3409_v17   ;;  %v3419_v48 = vpop.eup %2794  ;;  %v1332_v44 = vmul.f32 1.442695, %v1289_v43 }
 0x356   : > { %v1205_v62 = vpop.xlane.xlu0 %1204  ;;  %2796 = vpow2.f32 %v1328_v19  ;;  %4413 = vst [vmem:[#allocation6_spill] sm:$0xff] %v3419_v48 }
 0x357   : > { %v1242_v7 = vperm.slane %v1205_v62, 0  ;;  %v1243_v24 = vperm.slane %v1205_v62, 1  ;;  %2798 = vpow2.f32 %v1330_v22  ;;  %v1244_v33 = vperm.slane %v1205_v62, 2 }
 0x358   : > { %2800 = vpow2.f32 %v1326_v16  ;;  %v1245_v56 = vperm.slane %v1205_v62, 3 }
 0x359   : > { %v1306_v45 = vsub.f32 %v3228_v21, %v1242_v7  ;;  %v1307_v51 = vsub.f32 %v3222_v20, %v1243_v24  ;;  %v1308_v20 = vsub.f32 %v3238_v59, %v1244_v33 }
 0x35a   : > { %v1309_v21 = vsub.f32 %v3240_v26, %v1245_v56 }
 0x35b   : > { %v1366_v9 = vmul.f32 1.442695, %v1306_v45  ;;  %v1368_v34 = vmul.f32 1.442695, %v1307_v51  ;;  %v1370_v53 = vmul.f32 1.442695, %v1308_v20 }
 0x35c   : > { %v3421_v38 = vpop.eup %2796  ;;  %v1372_v50 = vmul.f32 1.442695, %v1309_v21 }
 0x35d   : > { %2802 = vpow2.f32 %v1366_v9  ;;  %1488 = vperm.xlu2 %2754, %v3419_v48   ;;  %v3424_v2 = vpop.eup %2798  ;;  %1434 = vperm.xlu1 %2753, %v3421_v38  }
 0x35e   : > { %2804 = vpow2.f32 %v1368_v34  ;;  %1437 = vperm.xlu0 %2752, %v3424_v2   ;;  %v3431_v4 = vpop.eup %2800 }
 0x35f   : > { %2806 = vpow2.f32 %v1332_v44 }
 0x360   : > { %2808 = vpow2.f32 %v1370_v53 }
 0x361   : > { %2810 = vpow2.f32 %v1372_v50 }
 0x363   : > { %v3433_v49 = vpop.eup %2802 }
 0x364   : > { %v3435_v3 = vpop.eup %2804 }
 0x365   : > { %4414 = vst [vmem:[#allocation7_spill] sm:$0xff] %v3435_v3  ;;  %1431 = vperm.xlu2 %2754, %v3431_v4   ;;  %v1193_v14 = vpop.xlane.xlu2 %1192  ;;  %1491 = vperm.xlu1 %2753, %v3433_v49   ;;  %v3443_v8 = vpop.eup %2806 }
 0x366   : > { %v1226_v59 = vperm.slane %v1193_v14, 0  ;;  %v1227_v63 = vperm.slane %v1193_v14, 1  ;;  %v1228_v0 = vperm.slane %v1193_v14, 2  ;;  %1494 = vperm.xlu0 %2752, %v3435_v3   ;;  %v1229_v10 = vperm.slane %v1193_v14, 3  ;;  %v3445_v57 = vpop.eup %2808 }
 0x367   : > { %v3448_v13 = vpop.eup %2810 }
 0x368   : > { %v1290_v26 = vsub.f32 %v3248_v29, %v1226_v59  ;;  %v1291_v23 = vsub.f32 %v3256_v31, %v1227_v63  ;;  %v1292_v60 = vsub.f32 %v3236_v25, %v1228_v0  ;;  %4415 = vst [vmem:[#allocation8_spill] sm:$0xff] %v3448_v13  ;;  %v1293_v15 = vsub.f32 %v3264_v35, %v1229_v10 }
 0x36a   : > { %v1338_v6 = vmul.f32 1.442695, %v1292_v60  ;;  %v1334_v1 = vmul.f32 1.442695, %v1290_v26  ;;  %v1336_v11 = vmul.f32 1.442695, %v1291_v23 }
 0x36b   : > { %v1340_v62 = vmul.f32 1.442695, %v1293_v15 }
 0x36c   : > { %2812 = vpow2.f32 %v1338_v6 }
 0x36d   : > { %1440 = vperm.xlu2 %2754, %v3443_v8   ;;  %1497 = vperm.xlu1 %2753, %v3445_v57   ;;  %2814 = vpow2.f32 %v1334_v1 }
 0x36e   : > { %v1196_v29 = vpop.xlane.xlu0 %1195  ;;  %1500 = vperm.xlu0 %2752, %v3448_v13   ;;  %2816 = vpow2.f32 %v1336_v11 }
 0x36f   : > { %v1230_v25 = vperm.slane %v1196_v29, 0  ;;  %v1231_v31 = vperm.slane %v1196_v29, 1  ;;  %v1232_v7 = vperm.slane %v1196_v29, 2  ;;  %v1233_v35 = vperm.slane %v1196_v29, 3 }
 0x371   : > { %v1294_v19 = vsub.f32 %v3272_v37, %v1230_v25  ;;  %v1295_v22 = vsub.f32 %v3252_v30, %v1231_v31  ;;  %v1296_v30 = vsub.f32 %v3279_v61, %v1232_v7  ;;  %v1297_v33 = vsub.f32 %v3287_v42, %v1233_v35 }
 0x372   : > { %v3455_v45 = vpop.eup %2812 }
 0x373   : > { %v1342_v24 = vmul.f32 1.442695, %v1294_v19  ;;  %v1344_v16 = vmul.f32 1.442695, %v1295_v22  ;;  %v3457_v51 = vpop.eup %2814  ;;  %v1346_v20 = vmul.f32 1.442695, %v1296_v30 }
 0x374   : > { %v3460_v28 = vpop.eup %2816  ;;  %v1348_v53 = vmul.f32 1.442695, %v1297_v33 }
 0x375   : > { %2818 = vpow2.f32 %v1342_v24  ;;  %1449 = vperm.xlu2 %2754, %v3455_v45   ;;  %1443 = vperm.xlu1 %2753, %v3457_v51  }
 0x376   : > { %2820 = vpow2.f32 %v1344_v16  ;;  %1446 = vperm.xlu0 %2752, %v3460_v28  }
 0x377   : > { %2822 = vpow2.f32 %v1340_v62  ;;  %v1199_v37 = vpop.xlane.xlu1 %1198 }
 0x378   : > { %v1234_v9 = vperm.slane %v1199_v37, 0  ;;  %v1237_v34 = vperm.slane %v1199_v37, 3  ;;  %v1235_v21 = vperm.slane %v1199_v37, 1  ;;  %v1236_v50 = vperm.slane %v1199_v37, 2 }
 0x37a   : > { %v1298_v56 = vsub.f32 %v3268_v36, %v1234_v9  ;;  %v1301_v61 = vsub.f32 %v3283_v41, %v1237_v34  ;;  %v1299_v36 = vsub.f32 %v3294_v46, %v1235_v21  ;;  %v1300_v42 = vsub.f32 %v3298_v47, %v1236_v50 }
 0x37b   : > { %v3467_v43 = vpop.eup %2818 }
 0x37c   : > { %v3469_v44 = vpop.eup %2820  ;;  %v1350_v14 = vmul.f32 1.442695, %v1298_v56  ;;  %v1356_v63 = vmul.f32 1.442695, %v1301_v61  ;;  %v1352_v0 = vmul.f32 1.442695, %v1299_v36 }
 0x37d   : > { %v3471_v59 = vpop.eup %2822  ;;  %1458 = vperm.xlu2 %2754, %v3469_v44   ;;  %v1354_v23 = vmul.f32 1.442695, %v1300_v42 }
 0x37e   : > { %2824 = vpow2.f32 %v1350_v14  ;;  %1452 = vperm.xlu1 %2753, %v3471_v59   ;;  %1455 = vperm.xlu0 %2752, %v3467_v43  }
 0x37f   : > { %2826 = vpow2.f32 %v1346_v20 }
 0x380   : > { %2828 = vpow2.f32 %v1348_v53 }
 0x381   : > { %2830 = vpow2.f32 %v1356_v63 }
 0x382   : > { %2832 = vpow2.f32 %v1352_v0 }
 0x383   : > { %2834 = vpow2.f32 %v1354_v23 }
 0x384   : > { %v3479_v26 = vpop.eup %2824 }
 0x385   : > { %v3481_v60 = vpop.eup %2826  ;;  %1467 = vperm.xlu2 %2754, %v3479_v26  }
 0x386   : > { %v3484_v41 = vpop.eup %2828  ;;  %1461 = vperm.xlu1 %2753, %v3481_v60  }
 0x387   : > { %1464 = vperm.xlu0 %2752, %v3484_v41   ;;  %v3488_v46 = vpop.eup %2830 }
 0x388   : > { %v3490_v47 = vpop.eup %2832 }
 0x389   : > { %v3493_v10 = vpop.eup %2834 }
 0x38d   : > { %1476 = vperm.xlu2 %2754, %v3488_v46  }
 0x38e   : > { %1470 = vperm.xlu1 %2753, %v3490_v47  }
 0x38f   : > { %1473 = vperm.xlu0 %2752, %v3493_v10  }
 0x396   : > { %v1411_v6 = vpop.permute.xlu2 %1410 }
 0x397   : > { %v1503_v25 = vperm.slane %v1411_v6, %v3303_v58 }
 0x39f   : > { %v1423_v1 = vpop.permute.xlu2 %1422 }
 0x3a0   : > { %v1507_v9 = vperm.slane %v1423_v1, %v3303_v58 }
 0x3ad   : > { %v1408_v11 = vpop.permute.xlu1 %1407 }
 0x3ae   : > { %v1502_v29 = vperm.slane %v1408_v11, %v3303_v58 }
 0x3af   : > { %v1414_v15 = vpop.permute.xlu0 %1413  ;;  %v1486_v31 = vpop.permute.xlu2 %1485 }
 0x3b0   : > { %v1504_v19 = vperm.slane %v1414_v15, %v3303_v58  ;;  %v1534_v22 = vsel %vm1146_vm9, %v1503_v25, %v1502_v29  ;;  %v1528_v6 = vperm.slane %v1486_v31, %v3303_v58 }
 0x3b2   : > { %v1535_v16 = vsel %vm1148_vm10, %v1504_v19, %v1534_v22 }
 0x3b5   : > { %v1417_v62 = vpop.permute.xlu1 %1416 }
 0x3b6   : > { %v1505_v7 = vperm.slane %v1417_v62, %v3303_v58 }
 0x3b7   : > { %v1420_v24 = vpop.permute.xlu0 %1419  ;;  %v1489_v33 = vpop.permute.xlu2 %1488 }
 0x3b8   : > { %v1536_v35 = vsel %vm4406_vm11, %v1505_v7, %v1535_v16  ;;  %v1506_v37 = vperm.slane %v1420_v24, %v3303_v58  ;;  %v1529_v1 = vperm.slane %v1489_v33, %v3303_v58 }
 0x3b9   : > { %v1566_v30 = vsel %vm1181_vm12, %v1536_v35, 0.0 }
 0x3ba   : > { %1567 = vadd.xlane.f32.xlu2 %v1566_v30  ;;  %v1537_v20 = vsel %vm1146_vm9, %v1507_v9, %v1506_v37 }
 0x3bd   : > { %v1426_v34 = vpop.permute.xlu1 %1425 }
 0x3be   : > { %v1508_v56 = vperm.slane %v1426_v34, %v3303_v58 }
 0x3bf   : > { %v1429_v21 = vpop.permute.xlu0 %1428  ;;  %v1432_v42 = vpop.permute.xlu2 %1431 }
 0x3c0   : > { %v1509_v53 = vperm.slane %v1429_v21, %v3303_v58  ;;  %v1538_v50 = vsel %vm1148_vm10, %v1508_v56, %v1537_v20  ;;  %v1510_v62 = vperm.slane %v1432_v42, %v3303_v58 }
 0x3c2   : > { %v1539_v14 = vsel %vm4406_vm11, %v1509_v53, %v1538_v50 }
 0x3c3   : > { %v1569_v61 = vsel %vm1181_vm12, %v1539_v14, 0.0 }
 0x3c4   : > { %1570 = vadd.xlane.f32.xlu1 %v1569_v61 }
 0x3c5   : > { %v1480_v36 = vpop.permute.xlu1 %1479 }
 0x3c6   : > { %v1526_v63 = vperm.slane %v1480_v36, %v3303_v58 }
 0x3c7   : > { %v1483_v0 = vpop.permute.xlu0 %1482  ;;  %v1441_v19 = vpop.permute.xlu2 %1440 }
 0x3c8   : > { %v1527_v23 = vperm.slane %v1483_v0, %v3303_v58  ;;  %v1513_v16 = vperm.slane %v1441_v19, %v3303_v58 }
 0x3ca   : > { %v1552_v11 = vsel %vm1146_vm9, %v1527_v23, %v1526_v63 }
 0x3cb   : > { %v1553_v15 = vsel %vm1148_vm10, %v1528_v6, %v1552_v11 }
 0x3cc   : > { %v1554_v29 = vsel %vm4406_vm11, %v1529_v1, %v1553_v15 }
 0x3cd   : > { %v1584_v25 = vsel %vm1181_vm12, %v1554_v29, 0.0 }
 0x3ce   : > { %1585 = vadd.xlane.f32.xlu2 %v1584_v25 }
 0x3cf   : > { %v1435_v22 = vpop.permute.xlu1 %1434  ;;  %v1450_v14 = vpop.permute.xlu2 %1449 }
 0x3d0   : > { %v1438_v7 = vpop.permute.xlu0 %1437  ;;  %v1511_v24 = vperm.slane %v1435_v22, %v3303_v58  ;;  %v1516_v25 = vperm.slane %v1450_v14, %v3303_v58 }
 0x3d1   : > { %v1512_v31 = vperm.slane %v1438_v7, %v3303_v58 }
 0x3d2   : > { %v1540_v35 = vsel %vm1146_vm9, %v1511_v24, %v1510_v62 }
 0x3d3   : > { %v1541_v30 = vsel %vm1148_vm10, %v1512_v31, %v1540_v35 }
 0x3d4   : > { %v1542_v37 = vsel %vm4406_vm11, %v1513_v16, %v1541_v30 }
 0x3d5   : > { %v1572_v33 = vsel %vm1181_vm12, %v1542_v37, 0.0 }
 0x3d6   : > { %1573 = vadd.xlane.f32.xlu0 %v1572_v33 }
 0x3d7   : > { %v1492_v9 = vpop.permute.xlu1 %1491  ;;  %v1459_v15 = vpop.permute.xlu2 %1458 }
 0x3d8   : > { %v1495_v34 = vpop.permute.xlu0 %1494  ;;  %v1530_v20 = vperm.slane %v1492_v9, %v3303_v58  ;;  %v1519_v30 = vperm.slane %v1459_v15, %v3303_v58 }
 0x3d9   : > { %v1531_v56 = vperm.slane %v1495_v34, %v3303_v58 }
 0x3db   : > { %v1555_v61 = vsel %vm1146_vm9, %v1531_v56, %v1530_v20 }
 0x3df   : > { %v1498_v21 = vpop.permute.xlu1 %1497  ;;  %v1468_v16 = vpop.permute.xlu2 %1467 }
 0x3e0   : > { %v1501_v53 = vpop.permute.xlu0 %1500  ;;  %v1532_v50 = vperm.slane %v1498_v21, %v3303_v58 }
 0x3e1   : > { %v1533_v36 = vperm.slane %v1501_v53, %v3303_v58 }
 0x3e2   : > { %v1556_v42 = vsel %vm1148_vm10, %v1532_v50, %v1555_v61  ;;  %v1522_v61 = vperm.slane %v1468_v16, %v3303_v58 }
 0x3e3   : > { %v1557_v63 = vsel %vm4406_vm11, %v1533_v36, %v1556_v42 }
 0x3e4   : > { %v1587_v0 = vsel %vm1181_vm12, %v1557_v63, 0.0 }
 0x3e5   : > { %1588 = vadd.xlane.f32.xlu1 %v1587_v0 }
 0x3e7   : > { %v1444_v23 = vpop.permute.xlu1 %1443  ;;  %v1477_v50 = vpop.permute.xlu2 %1476 }
 0x3e8   : > { %v1447_v6 = vpop.permute.xlu0 %1446  ;;  %v1514_v11 = vperm.slane %v1444_v23, %v3303_v58  ;;  %v1525_v0 = vperm.slane %v1477_v50, %v3303_v58 }
 0x3e9   : > { %v1515_v1 = vperm.slane %v1447_v6, %v3303_v58 }
 0x3eb   : > { %v1543_v29 = vsel %vm1146_vm9, %v1515_v1, %v1514_v11 }
 0x3ec   : > { %v1544_v7 = vsel %vm1148_vm10, %v1516_v25, %v1543_v29 }
 0x3f0   : > { %v1453_v19 = vpop.permute.xlu1 %1452  ;;  %v1456_v22 = vpop.permute.xlu0 %1455 }
 0x3f1   : > { %v1517_v62 = vperm.slane %v1453_v19, %v3303_v58  ;;  %v1518_v35 = vperm.slane %v1456_v22, %v3303_v58 }
 0x3f3   : > { %v1545_v24 = vsel %vm4406_vm11, %v1517_v62, %v1544_v7  ;;  %v1546_v34 = vsel %vm1146_vm9, %v1519_v30, %v1518_v35 }
 0x3f4   : > { %v1575_v31 = vsel %vm1181_vm12, %v1545_v24, 0.0 }
 0x3f5   : > { %1576 = vadd.xlane.f32.xlu2 %v1575_v31 }
 0x3f8   : > { %v1462_v37 = vpop.permute.xlu1 %1461 }
 0x3f9   : > { %v1465_v33 = vpop.permute.xlu0 %1464  ;;  %v1520_v9 = vperm.slane %v1462_v37, %v3303_v58 }
 0x3fa   : > { %v1521_v56 = vperm.slane %v1465_v33, %v3303_v58 }
 0x3fb   : > { %v1547_v20 = vsel %vm1148_vm10, %v1520_v9, %v1546_v34 }
 0x3fc   : > { %v1548_v21 = vsel %vm4406_vm11, %v1521_v56, %v1547_v20 }
 0x3fd   : > { %v1578_v53 = vsel %vm1181_vm12, %v1548_v21, 0.0 }
 0x3fe   : > { %1579 = vadd.xlane.f32.xlu1 %v1578_v53 }
 0x400   : > { %v1471_v14 = vpop.permute.xlu1 %1470 }
 0x401   : > { %v1474_v36 = vpop.permute.xlu0 %1473  ;;  %v1523_v42 = vperm.slane %v1471_v14, %v3303_v58 }
 0x402   : > { %v1524_v63 = vperm.slane %v1474_v36, %v3303_v58 }
 0x403   : > { %v1549_v23 = vsel %vm1146_vm9, %v1523_v42, %v1522_v61 }
 0x404   : > { %v1550_v6 = vsel %vm1148_vm10, %v1524_v63, %v1549_v23 }
 0x405   : > { %v1551_v1 = vsel %vm4406_vm11, %v1525_v0, %v1550_v6 }
 0x406   : > { %v1581_v11 = vsel %vm1181_vm12, %v1551_v1, 0.0 }
 0x407   : > { %1582 = vadd.xlane.f32.xlu0 %v1581_v11 }
 0x42d   : > { %v1568_v15 = vpop.xlane.xlu2 %1567 }
 0x42e   : > { %v1598_v29 = vperm.slane %v1568_v15, 0  ;;  %v1599_v25 = vperm.slane %v1568_v15, 1  ;;  %v1600_v19 = vperm.slane %v1568_v15, 2  ;;  %v3561_v22 = vperm.slane %v1568_v15, 3 }
 0x430   : > { %2836 = vrcp.f32 %v1598_v29  ;;  %v1703_v62 = vand.u32 2147483648, %v1600_v19  ;;  %v1688_v7 = vand.u32 2147483648, %v1599_v25  ;;  %v1671_v24 = vand.u32 2147483647, %v1598_v29 }
 0x431   : > { %2838 = vrcp.f32 %v1599_v25  ;;  %vm1697_vm13 = vweird.f32 %v1600_v19  ;;  %v1701_v16 = vand.u32 2147483647, %v1600_v19  ;;  %v1686_v35 = vand.u32 2147483647, %v1599_v25 }
 0x432   : > { %2840 = vrcp.f32 %v1600_v19  ;;  %v1673_v30 = vand.u32 2147483648, %v1598_v29  ;;  %v1704_v9 = vor.u32 1.1754944e-38, %v1703_v62  ;;  %vm1682_vm14 = vweird.f32 %v1599_v25 }
 0x433   : > { %2842 = vrcp.f32 %v3561_v22  ;;  %v1716_v56 = vand.u32 2147483647, %v3561_v22  ;;  %v1689_v53 = vor.u32 1.1754944e-38, %v1688_v7  ;;  %vm1667_vm15 = vweird.f32 %v1598_v29 }
 0x434   : > { %v1718_v50 = vand.u32 2147483648, %v3561_v22  ;;  %vm3575_vm1 = vcmp.eq.f32.partialorder %v1671_v24, 8.507059e+37  ;;  %vm1712_vm2 = vweird.f32 %v3561_v22  ;;  %vm3582_vm3 = vcmp.eq.f32.partialorder %v1701_v16, 8.507059e+37 }
 0x435   : > { %vm3586_vm4 = vcmp.eq.f32.partialorder %v1686_v35, 8.507059e+37  ;;  %v1674_v11 = vor.u32 1.1754944e-38, %v1673_v30  ;;  %vm3594_vm6 = vcmp.eq.f32.partialorder %v1716_v56, 8.507059e+37 }
 0x436   : > { %v2837_v31 = vpop.eup %2836 }
 0x437   : > { %v3564_v37 = vpop.eup %2838  ;;  %v1571_v33 = vpop.xlane.xlu1 %1570  ;;  %v1663_v34 = vmul.f32 %v2837_v31, %v1598_v29  ;;  %vm1668_vm5 = vweird.f32 %v2837_v31 }
 0x438   : > { %v2841_v20 = vpop.eup %2840  ;;  %v3567_v21 = vperm.slane %v1571_v33, 2  ;;  %v3572_v61 = vperm.slane %v1571_v33, 1  ;;  %v1678_v42 = vmul.f32 %v3564_v37, %v1599_v25  ;;  %v3580_v0 = vperm.slane %v1571_v33, 0  ;;  %vm3604_vm12 = vmor %vm1667_vm15, %vm1668_vm5 }
 0x439   : > { %v3570_v14 = vpop.eup %2842  ;;  %v1693_v36 = vmul.f32 %v2841_v20, %v1600_v19  ;;  %v1664_v1 = vsub.f32 1.0, %v1663_v34  ;;  %v3592_v62 = vperm.slane %v1571_v33, 3  ;;  %vm1698_vm7 = vweird.f32 %v2841_v20 }
 0x43a   : > { %v1708_v15 = vmul.f32 %v3570_v14, %v3561_v22  ;;  %v1679_v24 = vsub.f32 1.0, %v1678_v42  ;;  %2844 = vrcp.f32 %v3567_v21  ;;  %vm1683_vm8 = vweird.f32 %v3564_v37  ;;  %vm3611_vm0 = vmor %vm1697_vm13, %vm1698_vm7 }
 0x43b   : > { %v1694_v7 = vsub.f32 1.0, %v1693_v36  ;;  %v1665_v16 = vmul.f32 %v2837_v31, %v1664_v1  ;;  %2846 = vrcp.f32 %v3572_v61  ;;  %v1719_v42 = vor.u32 1.1754944e-38, %v1718_v50  ;;  %vm3618_vm15 = vmor %vm1682_vm14, %vm1683_vm8 }
 0x43c   : > { %v1709_v35 = vsub.f32 1.0, %v1708_v15  ;;  %v1680_v34 = vmul.f32 %v3564_v37, %v1679_v24  ;;  %2848 = vrcp.f32 %v3580_v0  ;;  %vm1713_vm11 = vweird.f32 %v3570_v14 }
 0x43d   : > { %v1695_v30 = vmul.f32 %v2841_v20, %v1694_v7  ;;  %v1666_v33 = vadd.f32 %v2837_v31, %v1665_v16  ;;  %2850 = vrcp.f32 %v3592_v62  ;;  %v1761_v19 = vand.u32 2147483647, %v3567_v21 }
 0x43e   : > { %v1710_v36 = vmul.f32 %v3570_v14, %v1709_v35  ;;  %v1681_v7 = vadd.f32 %v3564_v37, %v1680_v34  ;;  %v1763_v16 = vand.u32 2147483648, %v3567_v21  ;;  %v1746_v56 = vand.u32 2147483647, %v3572_v61 }
 0x43f   : > { %v1696_v1 = vadd.f32 %v2841_v20, %v1695_v30  ;;  %v1670_v50 = vsel %vm3604_vm12, %v2837_v31, %v1666_v33  ;;  %vm1757_vm13 = vweird.f32 %v3567_v21  ;;  %v1748_v23 = vand.u32 2147483648, %v3572_v61 }
 0x440   : > { %v1711_v24 = vadd.f32 %v3570_v14, %v1710_v36  ;;  %v1685_v25 = vsel %vm3618_vm15, %v3564_v37, %v1681_v7  ;;  %v1675_v34 = vsel %vm3575_vm1, %v1674_v11, %v1670_v50  ;;  %v3635_v31 = vpop.eup %2844  ;;  %vm3674_vm14 = vcmp.eq.f32.partialorder %v1761_v19, 8.507059e+37 }
 0x441   : > { %v1586_v35 = vpop.xlane.xlu2 %1585  ;;  %v1700_v30 = vsel %vm3611_vm0, %v2841_v20, %v1696_v1  ;;  %vm1714_vm0 = vmor %vm1712_vm2, %vm1713_vm11  ;;  %v3649_v37 = vpop.eup %2846  ;;  %v1690_v63 = vsel %vm3586_vm4, %v1689_v53, %v1685_v25  ;;  %v1676_v11 = vmul.f32 %v3375_v52, %v1675_v34  ;;  %vm1742_vm11 = vweird.f32 %v3572_v61 }
 0x442   : > { %v3637_v33 = vperm.slane %v1586_v35, 0  ;;  %v3639_v36 = vperm.slane %v1586_v35, 1  ;;  %v3641_v13 = vperm.slane %v1586_v35, 2  ;;  %v3643_v48 = vperm.slane %v1586_v35, 3  ;;  %v3658_v15 = vpop.eup %2848 }
 0x443   : > { %v1705_v20 = vsel %vm3582_vm3, %v1704_v9, %v1700_v30  ;;  %v1715_v1 = vsel %vm1714_vm0, %v3570_v14, %v1711_v24  ;;  %v1691_v7 = vmul.f32 %v3377_v27, %v1690_v63  ;;  %v3666_v53 = vpop.eup %2850  ;;  %2147 = vperm.xlu0 %2752, %v1676_v11   ;;  %v1753_v52 = vmul.f32 %v3635_v31, %v3567_v21 }
 0x444   : > { %2852 = vrcp.f32 %v3637_v33  ;;  %v1706_v22 = vmul.f32 %v3380_v55, %v1705_v20  ;;  %v1720_v9 = vsel %vm3594_vm6, %v1719_v42, %v1715_v1  ;;  %v1764_v14 = vor.u32 1.1754944e-38, %v1763_v16 }
 0x445   : > { %2854 = vrcp.f32 %v3639_v36  ;;  %2150 = vperm.xlu2 %2754, %v1691_v7   ;;  %v1721_v58 = vmul.f32 %v3386_v32, %v1720_v9  ;;  %v1738_v55 = vmul.f32 %v3649_v37, %v3572_v61  ;;  %vm3680_vm1 = vcmp.eq.f32.partialorder %v1746_v56, 8.507059e+37 }
 0x446   : > { %2856 = vrcp.f32 %v3641_v13  ;;  %2153 = vperm.xlu1 %2753, %v1706_v22   ;;  %v1754_v42 = vsub.f32 1.0, %v1753_v52  ;;  %vm1758_vm2 = vweird.f32 %v3635_v31  ;;  %v1723_v29 = vmul.f32 %v3658_v15, %v3580_v0 }
 0x447   : > { %2858 = vrcp.f32 %v3643_v48  ;;  %vm1727_vm3 = vweird.f32 %v3580_v0  ;;  %v1739_v32 = vsub.f32 1.0, %v1738_v55  ;;  %v1731_v50 = vand.u32 2147483647, %v3580_v0  ;;  %vm3718_vm12 = vmor %vm1757_vm13, %vm1758_vm2 }
 0x448   : > { %v1733_v24 = vand.u32 2147483648, %v3580_v0  ;;  %v1768_v19 = vmul.f32 %v3666_v53, %v3592_v62  ;;  %v1755_v16 = vmul.f32 %v3635_v31, %v1754_v42  ;;  %vm1743_vm4 = vweird.f32 %v3649_v37 }
 0x449   : > { %v1749_v35 = vor.u32 1.1754944e-38, %v1748_v23  ;;  %v1724_v30 = vsub.f32 1.0, %v1723_v29  ;;  %v1574_v34 = vpop.xlane.xlu0 %1573  ;;  %v1740_v56 = vmul.f32 %v3649_v37, %v1739_v32  ;;  %vm1728_vm5 = vweird.f32 %v3658_v15  ;;  %vm1744_vm15 = vmor %vm1742_vm11, %vm1743_vm4 }
 0x44a   : > { %v3695_v25 = vpop.eup %2852  ;;  %v1769_v20 = vsub.f32 1.0, %v1768_v19  ;;  %vm1772_vm6 = vweird.f32 %v3592_v62  ;;  %v3702_v11 = vperm.slane %v1574_v34, 0  ;;  %vm3704_vm7 = vcmp.eq.f32.partialorder %v1731_v50, 8.507059e+37  ;;  %vm1729_vm0 = vmor %vm1727_vm3, %vm1728_vm5 }
 0x44b   : > { %v3700_v63 = vpop.eup %2854  ;;  %v1734_v22 = vor.u32 1.1754944e-38, %v1733_v24  ;;  %vm1773_vm8 = vweird.f32 %v3666_v53  ;;  %v3711_v9 = vperm.slane %v1574_v34, 1  ;;  %v1756_v52 = vadd.f32 %v3635_v31, %v1755_v16  ;;  %2156 = vperm.xlu0 %2752, %v1721_v58  }
 0x44c   : > { %v3709_v7 = vpop.eup %2856  ;;  %v1741_v55 = vadd.f32 %v3649_v37, %v1740_v56  ;;  %v1725_v42 = vmul.f32 %v3658_v15, %v1724_v30  ;;  %v3726_v32 = vperm.slane %v1574_v34, 2  ;;  %v1770_v21 = vmul.f32 %v3666_v53, %v1769_v20  ;;  %vm1774_vm13 = vmor %vm1772_vm6, %vm1773_vm8 }
 0x44d   : > { %v3724_v29 = vpop.eup %2858  ;;  %v1776_v50 = vand.u32 2147483647, %v3592_v62  ;;  %v1778_v24 = vand.u32 2147483648, %v3592_v62  ;;  %v1760_v16 = vsel %vm3718_vm12, %v3635_v31, %v1756_v52  ;;  %v2023_v61 = vmul.f32 %v3695_v25, %v3637_v33 }
 0x44e   : > { %v3737_v19 = vmul.f32 %v3724_v29, %v3643_v48  ;;  %v1745_v58 = vsel %vm1744_vm15, %v3649_v37, %v1741_v55  ;;  %2860 = vrcp.f32 %v3702_v11  ;;  %v1765_v30 = vsel %vm3674_vm14, %v1764_v14, %v1760_v16 }
 0x44f   : > { %v1750_v56 = vsel %vm3680_vm1, %v1749_v35, %v1745_v58  ;;  %v1726_v20 = vadd.f32 %v3658_v15, %v1725_v42  ;;  %v3751_v3 = vperm.slane %v1574_v34, 3  ;;  %2862 = vrcp.f32 %v3711_v9 }
 0x450   : > { %v1766_v31 = vmul.f32 %v3398_v54, %v1765_v30  ;;  %v1751_v37 = vmul.f32 %v3391_v40, %v1750_v56  ;;  %v2069_v14 = vsub.f32 1.0, %v3737_v19  ;;  %2864 = vrcp.f32 %v3726_v32 }
 0x451   : > { %v1730_v27 = vsel %vm1729_vm0, %v3658_v15, %v1726_v20  ;;  %v1771_v6 = vadd.f32 %v3666_v53, %v1770_v21  ;;  %vm1777_vm11 = vcmp.eq.f32.partialorder %v1776_v50, 8.507059e+37  ;;  %v1779_v40 = vor.u32 1.1754944e-38, %v1778_v24 }
 0x452   : > { %2199 = vperm.xlu1 %2753, %v1766_v31   ;;  %2196 = vperm.xlu2 %2754, %v1751_v37   ;;  %v1735_v54 = vsel %vm3704_vm7, %v1734_v22, %v1730_v27  ;;  %v2024_v0 = vsub.f32 1.0, %v2023_v61  ;;  %v2031_v15 = vand.u32 2147483647, %v3637_v33  ;;  %v2033_v52 = vand.u32 2147483648, %v3637_v33 }
 0x453   : > { %v1736_v35 = vmul.f32 %v3388_v39, %v1735_v54  ;;  %v1775_v34 = vsel %vm1774_vm13, %v3666_v53, %v1771_v6  ;;  %vm2028_vm14 = vweird.f32 %v3695_v25  ;;  %v2053_v62 = vmul.f32 %v3709_v7, %v3641_v13 }
 0x454   : > { %v1780_v23 = vsel %vm1777_vm11, %v1779_v40, %v1775_v34  ;;  %v2025_v1 = vmul.f32 %v3695_v25, %v2024_v0  ;;  %v3778_v22 = vpop.eup %2860  ;;  %2866 = vrcp.f32 %v3751_v3  ;;  %vm2027_vm1 = vweird.f32 %v3637_v33 }
 0x455   : > { %2193 = vperm.xlu0 %2752, %v1736_v35   ;;  %v1781_v39 = vmul.f32 %v3401_v5, %v1780_v23  ;;  %vm2057_vm2 = vweird.f32 %v3641_v13  ;;  %v3784_v53 = vpop.eup %2862  ;;  %vm2032_vm3 = vcmp.eq.f32.partialorder %v2031_v15, 8.507059e+37  ;;  %v2034_v42 = vor.u32 1.1754944e-38, %v2033_v52  ;;  %vm2029_vm4 = vmor %vm2027_vm1, %vm2028_vm14 }
 0x456   : > { %v2026_v55 = vadd.f32 %v3695_v25, %v2025_v1  ;;  %v2054_v21 = vsub.f32 1.0, %v2053_v62  ;;  %v3787_v50 = vpop.eup %2864  ;;  %vm2058_vm5 = vweird.f32 %v3709_v7  ;;  %v2061_v24 = vand.u32 2147483647, %v3641_v13 }
 0x457   : > { %v2063_v5 = vand.u32 2147483648, %v3641_v13  ;;  %v2038_v33 = vmul.f32 %v3700_v63, %v3639_v36  ;;  %vm2042_vm6 = vweird.f32 %v3639_v36  ;;  %v2046_v61 = vand.u32 2147483647, %v3639_v36  ;;  %vm2059_vm12 = vmor %vm2057_vm2, %vm2058_vm5 }
 0x458   : > { %v2030_v16 = vsel %vm2029_vm4, %v3695_v25, %v2026_v55  ;;  %v2055_v58 = vmul.f32 %v3709_v7, %v2054_v21  ;;  %v1589_v56 = vpop.xlane.xlu1 %1588  ;;  %vm2043_vm7 = vweird.f32 %v3700_v63  ;;  %v2048_v31 = vand.u32 2147483648, %v3639_v36 }
 0x459   : > { %v2035_v30 = vsel %vm2032_vm3, %v2034_v42, %v2030_v16  ;;  %v2039_v20 = vsub.f32 1.0, %v2038_v33  ;;  %v3801_v27 = vperm.slane %v1589_v56, 0  ;;  %v3803_v6 = vperm.slane %v1589_v56, 1  ;;  %vm2044_vm0 = vmor %vm2042_vm6, %vm2043_vm7 }
 0x45a   : > { %2202 = vperm.xlu2 %2754, %v1781_v39   ;;  %v2036_v37 = vmul.f32 %v3405_v12, %v2035_v30  ;;  %v3805_v25 = vperm.slane %v1589_v56, 2  ;;  %v3807_v54 = vpop.eup %2866  ;;  %v3809_v40 = vperm.slane %v1589_v56, 3  ;;  %v2056_v0 = vadd.f32 %v3709_v7, %v2055_v58 }
 0x45b   : > { %vm2062_vm8 = vcmp.eq.f32.partialorder %v2061_v24, 8.507059e+37  ;;  %v2040_v35 = vmul.f32 %v3700_v63, %v2039_v20  ;;  %2868 = vrcp.f32 %v3801_v27  ;;  %v2064_v12 = vor.u32 1.1754944e-38, %v2063_v5 }
 0x45c   : > { %2418 = vperm.xlu1 %2753, %v2036_v37   ;;  %vm2047_vm15 = vcmp.eq.f32.partialorder %v2046_v61, 8.507059e+37  ;;  %v1798_v34 = vmul.f32 %v3784_v53, %v3711_v9  ;;  %2870 = vrcp.f32 %v3803_v6  ;;  %v2060_v15 = vsel %vm2059_vm12, %v3709_v7, %v2056_v0 }
 0x45d   : > { %v2041_v52 = vadd.f32 %v3700_v63, %v2040_v35  ;;  %v1806_v23 = vand.u32 2147483647, %v3711_v9  ;;  %2872 = vrcp.f32 %v3805_v25  ;;  %v2065_v1 = vsel %vm2062_vm8, %v2064_v12, %v2060_v15 }
 0x45e   : > { %v2049_v13 = vor.u32 1.1754944e-38, %v2048_v31  ;;  %v1799_v62 = vsub.f32 1.0, %v1798_v34  ;;  %2874 = vrcp.f32 %v3809_v40  ;;  %v2066_v39 = vmul.f32 %v3412_v18, %v2065_v1 }
 0x45f   : > { %v2045_v7 = vsel %vm2044_vm0, %v3700_v63, %v2041_v52  ;;  %v1808_v55 = vand.u32 2147483648, %v3711_v9  ;;  %vm1803_vm13 = vweird.f32 %v3784_v53  ;;  %v1783_v24 = vmul.f32 %v3778_v22, %v3702_v11 }
 0x460   : > { %v2050_v42 = vsel %vm2047_vm15, %v2049_v13, %v2045_v7  ;;  %v1800_v21 = vmul.f32 %v3784_v53, %v1799_v62  ;;  %2424 = vperm.xlu0 %2752, %v2066_v39   ;;  %vm1802_vm11 = vweird.f32 %v3711_v9  ;;  %vm3839_vm14 = vcmp.eq.f32.partialorder %v1806_v23, 8.507059e+37 }
 0x461   : > { %v2051_v36 = vmul.f32 %v3409_v17, %v2050_v42  ;;  %v1791_v18 = vand.u32 2147483647, %v3702_v11  ;;  %v3844_v63 = vpop.eup %2868  ;;  %v1784_v16 = vsub.f32 1.0, %v1783_v24  ;;  %v1793_v58 = vand.u32 2147483648, %v3702_v11  ;;  %vm1804_vm1 = vmor %vm1802_vm11, %vm1803_vm13 }
 0x462   : > { %v1801_v33 = vadd.f32 %v3784_v53, %v1800_v21  ;;  %v1813_v61 = vmul.f32 %v3787_v50, %v3726_v32  ;;  %v3850_v30 = vpop.eup %2870  ;;  %v2083_v17 = vmul.f32 %v3844_v63, %v3801_v27  ;;  %v1809_v9 = vor.u32 1.1754944e-38, %v1808_v55 }
 0x463   : > { %2421 = vperm.xlu2 %2754, %v2051_v36   ;;  %vm1787_vm2 = vweird.f32 %v3702_v11  ;;  %vm1788_vm3 = vweird.f32 %v3778_v22  ;;  %v3858_v56 = vpop.eup %2872  ;;  %v3862_v20 = vmul.f32 %v3850_v30, %v3803_v6  ;;  %v1785_v37 = vmul.f32 %v3778_v22, %v1784_v16 }
 0x464   : > { %v1805_v31 = vsel %vm1804_vm1, %v3784_v53, %v1801_v33  ;;  %vm3866_vm4 = vcmp.eq.f32.partialorder %v1791_v18, 8.507059e+37  ;;  %v3870_v35 = vpop.eup %2874  ;;  %v1814_v34 = vsub.f32 1.0, %v1813_v61  ;;  %vm1817_vm5 = vweird.f32 %v3726_v32  ;;  %vm1789_vm7 = vmor %vm1787_vm2, %vm1788_vm3 }
 0x465   : > { %v1810_v12 = vsel %vm3839_vm14, %v1809_v9, %v1805_v31  ;;  %vm1818_vm6 = vweird.f32 %v3787_v50  ;;  %v2084_v15 = vsub.f32 1.0, %v2083_v17  ;;  %v1786_v53 = vadd.f32 %v3778_v22, %v1785_v37 }
 0x466   : > { %v1811_v52 = vmul.f32 %v3421_v38, %v1810_v12  ;;  %v1794_v23 = vor.u32 1.1754944e-38, %v1793_v58  ;;  %v3880_v1 = vmul.f32 %v3858_v56, %v3805_v25  ;;  %v1815_v13 = vmul.f32 %v3787_v50, %v1814_v34  ;;  %vm1819_vm12 = vmor %vm1817_vm5, %vm1818_vm6 }
 0x467   : > { %v1821_v62 = vand.u32 2147483647, %v3726_v32  ;;  %v1823_v39 = vand.u32 2147483648, %v3726_v32  ;;  %v2099_v38 = vsub.f32 1.0, %v3862_v20  ;;  %v3892_v7 = vmul.f32 %v3870_v35, %v3809_v40 }
 0x468   : > { %2241 = vperm.xlu1 %2753, %v1811_v52   ;;  %v1790_v55 = vsel %vm1789_vm7, %v3778_v22, %v1786_v53  ;;  %v1577_v42 = vpop.xlane.xlu2 %1576  ;;  %v1828_v11 = vmul.f32 %v3807_v54, %v3751_v3  ;;  %v1816_v24 = vadd.f32 %v3787_v50, %v1815_v13  ;;  %vm1833_vm15 = vweird.f32 %v3807_v54 }
 0x469   : > { %v1795_v21 = vsel %vm3866_vm4, %v1794_v23, %v1790_v55  ;;  %vm1822_vm8 = vcmp.eq.f32.partialorder %v1821_v62, 8.507059e+37  ;;  %v1824_v36 = vor.u32 1.1754944e-38, %v1823_v39  ;;  %v3905_v18 = vperm.slane %v1577_v42, 0 }
 0x46a   : > { %v1796_v5 = vmul.f32 %v3431_v4, %v1795_v21  ;;  %v3907_v22 = vperm.slane %v1577_v42, 1  ;;  %v3909_v33 = vperm.slane %v1577_v42, 2  ;;  %v1820_v16 = vsel %vm1819_vm12, %v3787_v50, %v1816_v24 }
 0x46b   : > { %v3912_v58 = vperm.slane %v1577_v42, 3  ;;  %v1829_v61 = vsub.f32 1.0, %v1828_v11  ;;  %v1825_v4 = vsel %vm1822_vm8, %v1824_v36, %v1820_v16  ;;  %2876 = vrcp.f32 %v3905_v18 }
 0x46c   : > { %2238 = vperm.xlu0 %2752, %v1796_v5   ;;  %v1836_v32 = vand.u32 2147483647, %v3751_v3  ;;  %v1838_v17 = vand.u32 2147483648, %v3751_v3  ;;  %v1826_v9 = vmul.f32 %v3424_v2, %v1825_v4  ;;  %2878 = vrcp.f32 %v3907_v22 }
 0x46d   : > { %v1830_v31 = vmul.f32 %v3807_v54, %v1829_v61  ;;  %v2085_v50 = vmul.f32 %v3844_v63, %v2084_v15  ;;  %v2114_v37 = vsub.f32 1.0, %v3880_v1  ;;  %2880 = vrcp.f32 %v3909_v33 }
 0x46e   : > { %vm1832_vm0 = vweird.f32 %v3751_v3  ;;  %vm2087_vm13 = vweird.f32 %v3801_v27  ;;  %2244 = vperm.xlu2 %2754, %v1826_v9   ;;  %2882 = vrcp.f32 %v3912_v58  ;;  %vm2088_vm14 = vweird.f32 %v3844_v63 }
 0x46f   : > { %v1831_v0 = vadd.f32 %v3807_v54, %v1830_v31  ;;  %vm1834_vm11 = vmor %vm1832_vm0, %vm1833_vm15  ;;  %v2086_v2 = vadd.f32 %v3844_v63, %v2085_v50  ;;  %vm1837_vm1 = vcmp.eq.f32.partialorder %v1836_v32, 8.507059e+37  ;;  %v1839_v12 = vor.u32 1.1754944e-38, %v1838_v17 }
 0x470   : > { %vm3932_vm2 = vmor %vm2087_vm13, %vm2088_vm14  ;;  %v2091_v3 = vand.u32 2147483647, %v3801_v27  ;;  %v2093_v15 = vand.u32 2147483648, %v3801_v27  ;;  %v1866_v13 = vand.u32 2147483647, %v3907_v22  ;;  %v1868_v62 = vand.u32 2147483648, %v3907_v22 }
 0x471   : > { %v1835_v52 = vsel %vm1834_vm11, %v3807_v54, %v1831_v0  ;;  %v2090_v53 = vsel %vm3932_vm2, %v3844_v63, %v2086_v2  ;;  %v1580_v23 = vpop.xlane.xlu1 %1579  ;;  %v3944_v39 = vpop.eup %2876  ;;  %vm1862_vm4 = vweird.f32 %v3907_v22  ;;  %vm1847_vm6 = vweird.f32 %v3905_v18 }
 0x472   : > { %v1840_v55 = vsel %vm1837_vm1, %v1839_v12, %v1835_v52  ;;  %vm2092_vm3 = vcmp.eq.f32.partialorder %v2091_v3, 8.507059e+37  ;;  %v2094_v42 = vor.u32 1.1754944e-38, %v2093_v15  ;;  %v3946_v11 = vperm.slane %v1580_v23, 0  ;;  %v2879_v27 = vpop.eup %2878 }
 0x473   : > { %v1841_v54 = vmul.f32 %v3443_v8, %v1840_v55  ;;  %v3950_v21 = vperm.slane %v1580_v23, 1  ;;  %v3952_v63 = vperm.slane %v1580_v23, 2  ;;  %v3954_v24 = vperm.slane %v1580_v23, 3  ;;  %v3956_v36 = vpop.eup %2880 }
 0x474   : > { %v1858_v5 = vmul.f32 %v2879_v27, %v3907_v22  ;;  %v2095_v16 = vsel %vm2092_vm3, %v2094_v42, %v2090_v53  ;;  %2884 = vrcp.f32 %v3946_v11  ;;  %vm1863_vm5 = vweird.f32 %v2879_v27  ;;  %v3961_v61 = vpop.eup %2882 }
 0x475   : > { %v2096_v8 = vmul.f32 %v3433_v49, %v2095_v16  ;;  %2886 = vrcp.f32 %v3950_v21  ;;  %vm3965_vm7 = vcmp.eq.f32.partialorder %v1866_v13, 8.507059e+37  ;;  %v1869_v32 = vor.u32 1.1754944e-38, %v1868_v62  ;;  %vm1864_vm13 = vmor %vm1862_vm4, %vm1863_vm5 }
 0x476   : > { %v1859_v17 = vsub.f32 1.0, %v1858_v5  ;;  %v1888_v9 = vmul.f32 %v3961_v61, %v3912_v58  ;;  %2888 = vrcp.f32 %v3952_v63  ;;  %v1843_v31 = vmul.f32 %v3944_v39, %v3905_v18  ;;  %2247 = vperm.xlu2 %2754, %v1841_v54  }
 0x477   : > { %2463 = vperm.xlu1 %2753, %v2096_v8   ;;  %2890 = vrcp.f32 %v3954_v24  ;;  %vm1848_vm8 = vweird.f32 %v3944_v39  ;;  %v1851_v49 = vand.u32 2147483647, %v3905_v18  ;;  %v1853_v50 = vand.u32 2147483648, %v3905_v18 }
 0x478   : > { %v1889_v0 = vsub.f32 1.0, %v1888_v9  ;;  %v1860_v2 = vmul.f32 %v2879_v27, %v1859_v17  ;;  %v1844_v12 = vsub.f32 1.0, %v1843_v31  ;;  %vm1892_vm12 = vweird.f32 %v3912_v58  ;;  %vm1849_vm11 = vmor %vm1847_vm6, %vm1848_vm8 }
 0x479   : > { %vm3979_vm15 = vcmp.eq.f32.partialorder %v1851_v49, 8.507059e+37  ;;  %v1854_v3 = vor.u32 1.1754944e-38, %v1853_v50  ;;  %vm1893_vm0 = vweird.f32 %v3961_v61  ;;  %v1896_v15 = vand.u32 2147483647, %v3912_v58 }
 0x47a   : > { %v3985_v52 = vpop.eup %2884  ;;  %v1583_v53 = vpop.xlane.xlu0 %1582  ;;  %v1861_v23 = vadd.f32 %v2879_v27, %v1860_v2  ;;  %v1845_v13 = vmul.f32 %v3944_v39, %v1844_v12  ;;  %v1890_v62 = vmul.f32 %v3961_v61, %v1889_v0  ;;  %v1898_v55 = vand.u32 2147483648, %v3912_v58  ;;  %vm4035_vm14 = vmor %vm1892_vm12, %vm1893_vm0 }
 0x47b   : > { %v3990_v42 = vpop.eup %2886  ;;  %v1903_v54 = vmul.f32 %v3985_v52, %v3946_v11  ;;  %v3994_v5 = vperm.slane %v1583_v53, 0  ;;  %v3996_v16 = vperm.slane %v1583_v53, 1  ;;  %v3998_v8 = vperm.slane %v1583_v53, 2 }
 0x47c   : > { %v4003_v17 = vpop.eup %2888  ;;  %v4005_v9 = vperm.slane %v1583_v53, 3  ;;  %v1865_v31 = vsel %vm1864_vm13, %v2879_v27, %v1861_v23  ;;  %v1846_v49 = vadd.f32 %v3944_v39, %v1845_v13  ;;  %v1891_v50 = vadd.f32 %v3961_v61, %v1890_v62 }
 0x47d   : > { %v4009_v0 = vpop.eup %2890  ;;  %v1904_v2 = vsub.f32 1.0, %v1903_v54  ;;  %v1933_v12 = vmul.f32 %v4003_v17, %v3952_v63  ;;  %2892 = vrcp.f32 %v3994_v5  ;;  %v1870_v22 = vsel %vm3965_vm7, %v1869_v32, %v1865_v31 }
 0x47e   : > { %v4022_v27 = vmul.f32 %v4009_v0, %v3954_v24  ;;  %2894 = vrcp.f32 %v3996_v16  ;;  %v1871_v53 = vmul.f32 %v3460_v28, %v1870_v22  ;;  %v1850_v23 = vsel %vm1849_vm11, %v3944_v39, %v1846_v49 }
 0x47f   : > { %v2129_v13 = vsub.f32 1.0, %v3892_v7  ;;  %v1934_v62 = vsub.f32 1.0, %v1933_v12  ;;  %2896 = vrcp.f32 %v3998_v8  ;;  %v1855_v4 = vsel %vm3979_vm15, %v1854_v3, %v1850_v23 }
 0x480   : > { %v1949_v28 = vsub.f32 1.0, %v4022_v27  ;;  %2898 = vrcp.f32 %v4005_v9  ;;  %2286 = vperm.xlu1 %2753, %v1871_v53   ;;  %v1856_v39 = vmul.f32 %v3457_v51, %v1855_v4  ;;  %v1895_v32 = vsel %vm4035_vm14, %v3961_v61, %v1891_v50 }
 0x481   : > { %vm1897_vm1 = vcmp.eq.f32.partialorder %v1896_v15, 8.507059e+37  ;;  %v1899_v34 = vor.u32 1.1754944e-38, %v1898_v55  ;;  %v1873_v58 = vmul.f32 %v3956_v36, %v3909_v33  ;;  %vm1877_vm2 = vweird.f32 %v3909_v33 }
 0x482   : > { %2283 = vperm.xlu0 %2752, %v1856_v39   ;;  %vm1878_vm3 = vweird.f32 %v3956_v36  ;;  %v1881_v3 = vand.u32 2147483647, %v3909_v33  ;;  %v1883_v54 = vand.u32 2147483648, %v3909_v33  ;;  %v1905_v51 = vmul.f32 %v3985_v52, %v1904_v2 }
 0x483   : > { %v4052_v31 = vpop.eup %2892  ;;  %v1900_v49 = vsel %vm1897_vm1, %v1899_v34, %v1895_v32  ;;  %v1874_v61 = vsub.f32 1.0, %v1873_v58  ;;  %vm1908_vm4 = vweird.f32 %v3985_v52  ;;  %v1911_v15 = vand.u32 2147483647, %v3946_v11  ;;  %vm1879_vm12 = vmor %vm1877_vm2, %vm1878_vm3 }
 0x484   : > { %v4056_v55 = vpop.eup %2894  ;;  %v1963_v50 = vmul.f32 %v4052_v31, %v3994_v5  ;;  %v1901_v12 = vmul.f32 %v3471_v59, %v1900_v49  ;;  %vm4061_vm5 = vcmp.eq.f32.partialorder %v1881_v3, 8.507059e+37  ;;  %vm1907_vm6 = vweird.f32 %v3946_v11 }
 0x485   : > { %v4066_v2 = vpop.eup %2896  ;;  %v1875_v53 = vmul.f32 %v3956_v36, %v1874_v61  ;;  %v1884_v23 = vor.u32 1.1754944e-38, %v1883_v54  ;;  %v1906_v4 = vadd.f32 %v3985_v52, %v1905_v51  ;;  %v1913_v18 = vand.u32 2147483648, %v3946_v11  ;;  %vm4079_vm7 = vmor %vm1907_vm6, %vm1908_vm4 }
 0x486   : > { %v4071_v39 = vpop.eup %2898  ;;  %v1964_v32 = vsub.f32 1.0, %v1963_v50  ;;  %v4075_v59 = vmul.f32 %v4066_v2, %v3998_v8  ;;  %vm1912_vm8 = vcmp.eq.f32.partialorder %v1911_v15, 8.507059e+37  ;;  %v1935_v58 = vmul.f32 %v4003_v17, %v1934_v62 }
 0x487   : > { %v4086_v3 = vmul.f32 %v4071_v39, %v4005_v9  ;;  %v1876_v11 = vadd.f32 %v3956_v36, %v1875_v53  ;;  %v1910_v54 = vsel %vm4079_vm7, %v3985_v52, %v1906_v4  ;;  %v1914_v51 = vor.u32 1.1754944e-38, %v1913_v18 }
 0x488   : > { %2292 = vperm.xlu1 %2753, %v1901_v12   ;;  %v1936_v49 = vadd.f32 %v4003_v17, %v1935_v58  ;;  %vm1937_vm15 = vweird.f32 %v3952_v63  ;;  %vm1938_vm0 = vweird.f32 %v4003_v17  ;;  %v1941_v62 = vand.u32 2147483647, %v3952_v63 }
 0x489   : > { %v1994_v61 = vsub.f32 1.0, %v4075_v59  ;;  %v1880_v15 = vsel %vm1879_vm12, %v3956_v36, %v1876_v11  ;;  %v1915_v52 = vsel %vm1912_vm8, %v1914_v51, %v1910_v54  ;;  %vm4102_vm13 = vmor %vm1937_vm15, %vm1938_vm0  ;;  %v1943_v33 = vand.u32 2147483648, %v3952_v63 }
 0x48a   : > { %v2009_v12 = vsub.f32 1.0, %v4086_v3  ;;  %v1885_v53 = vsel %vm4061_vm5, %v1884_v23, %v1880_v15  ;;  %v1916_v4 = vmul.f32 %v3467_v43, %v1915_v52  ;;  %v1940_v18 = vsel %vm4102_vm13, %v4003_v17, %v1936_v49 }
 0x48b   : > { %v1886_v36 = vmul.f32 %v3455_v45, %v1885_v53  ;;  %vm1942_vm11 = vcmp.eq.f32.partialorder %v1941_v62, 8.507059e+37  ;;  %v1944_v59 = vor.u32 1.1754944e-38, %v1943_v33  ;;  %v1918_v34 = vmul.f32 %v3990_v42, %v3950_v21 }
 0x48c   : > { %2328 = vperm.xlu2 %2754, %v1916_v4   ;;  %vm1922_vm14 = vweird.f32 %v3950_v21  ;;  %v1926_v63 = vand.u32 2147483647, %v3950_v21  ;;  %v1928_v22 = vand.u32 2147483648, %v3950_v21  ;;  %v1965_v43 = vmul.f32 %v4052_v31, %v1964_v32 }
 0x48d   : > { %2289 = vperm.xlu0 %2752, %v1886_v36   ;;  %v1945_v23 = vsel %vm1942_vm11, %v1944_v59, %v1940_v18  ;;  %v1919_v58 = vsub.f32 1.0, %v1918_v34  ;;  %vm1923_vm1 = vweird.f32 %v3990_v42  ;;  %vm1968_vm2 = vweird.f32 %v4052_v31 }
 0x48e   : > { %v1946_v45 = vmul.f32 %v3481_v60, %v1945_v23  ;;  %vm4124_vm3 = vcmp.eq.f32.partialorder %v1926_v63, 8.507059e+37  ;;  %v1966_v11 = vadd.f32 %v4052_v31, %v1965_v43  ;;  %vm1967_vm4 = vweird.f32 %v3994_v5  ;;  %vm1924_vm7 = vmor %vm1922_vm14, %vm1923_vm1 }
 0x48f   : > { %v1920_v54 = vmul.f32 %v3990_v42, %v1919_v58  ;;  %vm4131_vm5 = vmor %vm1967_vm4, %vm1968_vm2  ;;  %v1971_v51 = vand.u32 2147483647, %v3994_v5  ;;  %v1973_v49 = vand.u32 2147483648, %v3994_v5  ;;  %v1950_v60 = vmul.f32 %v4009_v0, %v1949_v28 }
 0x490   : > { %2334 = vperm.xlu1 %2753, %v1946_v45   ;;  %v1929_v62 = vor.u32 1.1754944e-38, %v1928_v22  ;;  %v1970_v15 = vsel %vm4131_vm5, %v4052_v31, %v1966_v11  ;;  %vm1953_vm6 = vweird.f32 %v4009_v0  ;;  %v1956_v52 = vand.u32 2147483647, %v3954_v24 }
 0x491   : > { %v1921_v50 = vadd.f32 %v3990_v42, %v1920_v54  ;;  %v1974_v5 = vor.u32 1.1754944e-38, %v1973_v49  ;;  %v1951_v27 = vadd.f32 %v4009_v0, %v1950_v60  ;;  %vm1952_vm8 = vweird.f32 %v3954_v24 }
 0x492   : > { %vm1972_vm12 = vcmp.eq.f32.partialorder %v1971_v51, 8.507059e+37  ;;  %vm4152_vm15 = vmor %vm1952_vm8, %vm1953_vm6  ;;  %vm4156_vm0 = vcmp.eq.f32.partialorder %v1956_v52, 8.507059e+37  ;;  %v1958_v33 = vand.u32 2147483648, %v3954_v24  ;;  %v1978_v21 = vmul.f32 %v4056_v55, %v3996_v16 }
 0x493   : > { %v1925_v53 = vsel %vm1924_vm7, %v3990_v42, %v1921_v50  ;;  %v1975_v4 = vsel %vm1972_vm12, %v1974_v5, %v1970_v15  ;;  %v1955_v18 = vsel %vm4152_vm15, %v4009_v0, %v1951_v27  ;;  %vm1982_vm13 = vweird.f32 %v3996_v16 }
 0x494   : > { %v1930_v36 = vsel %vm4124_vm3, %v1929_v62, %v1925_v53  ;;  %v1976_v59 = vmul.f32 %v3479_v26, %v1975_v4  ;;  %v1959_v34 = vor.u32 1.1754944e-38, %v1958_v33  ;;  %v1979_v63 = vsub.f32 1.0, %v1978_v21 }
 0x495   : > { %v1931_v24 = vmul.f32 %v3469_v44, %v1930_v36  ;;  %v1986_v22 = vand.u32 2147483647, %v3996_v16  ;;  %v1988_v42 = vand.u32 2147483648, %v3996_v16  ;;  %v1995_v43 = vmul.f32 %v4066_v2, %v1994_v61 }
 0x496   : > { %2373 = vperm.xlu2 %2754, %v1976_v59   ;;  %v1960_v0 = vsel %vm4156_vm0, %v1959_v34, %v1955_v18  ;;  %v1980_v23 = vmul.f32 %v4056_v55, %v1979_v63  ;;  %vm1983_vm11 = vweird.f32 %v4056_v55  ;;  %vm1998_vm14 = vweird.f32 %v4066_v2  ;;  %v4474_v18 = vld [vmem:[#allocation7_spill] sm:$0xff] }
 0x497   : > { %2331 = vperm.xlu0 %2752, %v1931_v24   ;;  %v1961_v26 = vmul.f32 %v3484_v41, %v1960_v0  ;;  %vm4181_vm1 = vcmp.eq.f32.partialorder %v1986_v22, 8.507059e+37  ;;  %v1996_v58 = vadd.f32 %v4066_v2, %v1995_v43  ;;  %vm1997_vm2 = vweird.f32 %v3998_v8  ;;  %vm1984_vm4 = vmor %vm1982_vm13, %vm1983_vm11  ;;  %v4475_v43 = vld [vmem:[#allocation6_spill] sm:$0xff] }
 0x498   : > { %v1981_v61 = vadd.f32 %v4056_v55, %v1980_v23  ;;  %vm4188_vm3 = vmor %vm1997_vm2, %vm1998_vm14  ;;  %v2001_v17 = vand.u32 2147483647, %v3998_v8  ;;  %v2003_v11 = vand.u32 2147483648, %v3998_v8  ;;  %v2115_v41 = vmul.f32 %v3858_v56, %v2114_v37  ;;  %v4476_v23 = vld [vmem:[#allocation8_spill] sm:$0xff] }
 0x499   : > { %2337 = vperm.xlu1 %2753, %v1961_v26   ;;  %v1989_v54 = vor.u32 1.1754944e-38, %v1988_v42  ;;  %v2000_v32 = vsel %vm4188_vm3, %v4066_v2, %v1996_v58  ;;  %vm2117_vm5 = vweird.f32 %v3805_v25  ;;  %vm2118_vm6 = vweird.f32 %v3858_v56  ;;  %v4477_v58 = vld [vmem:[#allocation5_spill] sm:$0xff] }
 0x49a   : > { %v1985_v51 = vsel %vm1984_vm4, %v4056_v55, %v1981_v61  ;;  %v2004_v8 = vor.u32 1.1754944e-38, %v2003_v11  ;;  %v2116_v1 = vadd.f32 %v3858_v56, %v2115_v41  ;;  %v2121_v37 = vand.u32 2147483647, %v3805_v25  ;;  %vm4209_vm8 = vmor %vm2117_vm5, %vm2118_vm6 }
 0x49b   : > { %v1990_v16 = vsel %vm4181_vm1, %v1989_v54, %v1985_v51  ;;  %vm2002_vm7 = vcmp.eq.f32.partialorder %v2001_v17, 8.507059e+37  ;;  %v2123_v2 = vand.u32 2147483648, %v3805_v25  ;;  %v2010_v60 = vmul.f32 %v4071_v39, %v2009_v12 }
 0x49c   : > { %v1991_v55 = vmul.f32 %v3490_v47, %v1990_v16  ;;  %v2005_v62 = vsel %vm2002_vm7, %v2004_v8, %v2000_v32  ;;  %v2120_v15 = vsel %vm4209_vm8, %v3858_v56, %v2116_v1  ;;  %vm2012_vm12 = vweird.f32 %v4005_v9  ;;  %v2900_v8 = vld [vmem:[%s3063_s22 + $0x20] sm:$0xff] }
 0x49d   : > { %v2006_v52 = vmul.f32 %v3493_v10, %v2005_v62  ;;  %v2124_v50 = vor.u32 1.1754944e-38, %v2123_v2  ;;  %v2011_v5 = vadd.f32 %v4071_v39, %v2010_v60  ;;  %vm2013_vm15 = vweird.f32 %v4071_v39 }
 0x49e   : > { %vm2122_vm0 = vcmp.eq.f32.partialorder %v2121_v37, 8.507059e+37  ;;  %vm4225_vm13 = vmor %vm2012_vm12, %vm2013_vm15  ;;  %v2016_v47 = vand.u32 2147483647, %v4005_v9  ;;  %v2018_v3 = vand.u32 2147483648, %v4005_v9  ;;  %v2100_v56 = vmul.f32 %v3850_v30, %v2099_v38 }
 0x49f   : > { %2376 = vperm.xlu0 %2752, %v1991_v55   ;;  %2379 = vperm.xlu2 %2754, %v2006_v52   ;;  %v2125_v10 = vsel %vm2122_vm0, %v2124_v50, %v2120_v15  ;;  %v2015_v12 = vsel %vm4225_vm13, %v4071_v39, %v2011_v5  ;;  %vm2103_vm11 = vweird.f32 %v3850_v30  ;;  %v2106_v27 = vand.u32 2147483647, %v3803_v6  ;;  %v2151_v42 = vpop.permute.xlu2 %2150  ;;  %v2901_v5 = vld [vmem:[%s3063_s22 + $0x28] sm:$0xff] }
 0x4a0   : > { %v2126_v28 = vmul.f32 %v3445_v57, %v2125_v10  ;;  %v2019_v31 = vor.u32 1.1754944e-38, %v2018_v3  ;;  %v2101_v9 = vadd.f32 %v3850_v30, %v2100_v56  ;;  %vm2102_vm14 = vweird.f32 %v3803_v6 }
 0x4a1   : > { %vm2017_vm1 = vcmp.eq.f32.partialorder %v2016_v47, 8.507059e+37  ;;  %vm4242_vm2 = vmor %vm2102_vm14, %vm2103_vm11  ;;  %v2108_v38 = vand.u32 2147483648, %v3803_v6  ;;  %v2070_v39 = vmul.f32 %v3724_v29, %v2069_v14  ;;  %vm2107_vm3 = vcmp.eq.f32.partialorder %v2106_v27, 8.507059e+37 }
 0x4a2   : > { %2469 = vperm.xlu1 %2753, %v2126_v28   ;;  %v2020_v33 = vsel %vm2017_vm1, %v2019_v31, %v2015_v12  ;;  %v2105_v57 = vsel %vm4242_vm2, %v3850_v30, %v2101_v9  ;;  %vm2073_vm4 = vweird.f32 %v3724_v29  ;;  %vm2072_vm5 = vweird.f32 %v3643_v48 }
 0x4a3   : > { %v2109_v21 = vor.u32 1.1754944e-38, %v2108_v38  ;;  %v2071_v53 = vadd.f32 %v3724_v29, %v2070_v39  ;;  %v2078_v6 = vand.u32 2147483648, %v3643_v48  ;;  %v2130_v19 = vmul.f32 %v3870_v35, %v2129_v13  ;;  %vm2074_vm8 = vmor %vm2072_vm5, %vm2073_vm4 }
 0x4a4   : > { %vm2133_vm6 = vweird.f32 %v3870_v35  ;;  %v2021_v14 = vmul.f32 %v3488_v46, %v2020_v33  ;;  %v2076_v30 = vand.u32 2147483647, %v3643_v48  ;;  %vm2132_vm7 = vweird.f32 %v3809_v40 }
 0x4a5   : > { %v2110_v4 = vsel %vm2107_vm3, %v2109_v21, %v2105_v57  ;;  %v2131_v59 = vadd.f32 %v3870_v35, %v2130_v19  ;;  %v2136_v34 = vand.u32 2147483647, %v3809_v40  ;;  %v2138_v7 = vand.u32 2147483648, %v3809_v40  ;;  %vm2134_vm12 = vmor %vm2132_vm7, %vm2133_vm6 }
 0x4a6   : > { %v2111_v36 = vmul.f32 %v4474_v18, %v2110_v4  ;;  %v2075_v13 = vsel %vm2074_vm8, %v3724_v29, %v2071_v53  ;;  %v2079_v46 = vor.u32 1.1754944e-38, %v2078_v6  ;;  %vm2077_vm15 = vcmp.eq.f32.partialorder %v2076_v30, 8.507059e+37  ;;  %v2902_v6 = vld [vmem:[%s3063_s22 + $0x30] sm:$0xff] }
 0x4a7   : > { %2382 = vperm.xlu0 %2752, %v2021_v14   ;;  %v2135_v63 = vsel %vm2134_vm12, %v3870_v35, %v2131_v59  ;;  %v2139_v48 = vor.u32 1.1754944e-38, %v2138_v7  ;;  %vm2137_vm0 = vcmp.eq.f32.partialorder %v2136_v34, 8.507059e+37  ;;  %v2159_v35 = vperm.slane %v2151_v42, %v4477_v58  ;;  %v2903_v42 = vld [vmem:[%s3063_s22 + $0x38] sm:$0xff] }
 0x4a8   : > { %2466 = vperm.xlu2 %2754, %v2111_v36   ;;  %v2080_v24 = vsel %vm2077_vm15, %v2079_v46, %v2075_v13  ;;  %vm2165_vm13 = vcmask 64512   ;;  %vm4478_vm11 = vcmask 1043459   ;;  %vm2512_vm7 = vcmask 257024  }
 0x4a9   : > { %v2140_v22 = vsel %vm2137_vm0, %v2139_v48, %v2135_v63  ;;  %v2081_v0 = vmul.f32 %v4475_v43, %v2080_v24  ;;  %vm4479_vm14 = vmmov %vm4478_vm11  ;;  %vm2580_vm8 = vcmask 1044484   ;;  %vm2582_vm12 = vcmask 1045509  }
 0x4aa   : > { %v2141_v26 = vmul.f32 %v4476_v23, %v2140_v22  ;;  %vm4480_vm1 = vmmov %vm4478_vm11  ;;  %vm2584_vm0 = vcmask 1046534  }
 0x4ab   : > { %vm4481_vm2 = vmmov %vm4480_vm1 }
 0x4ac   : > { %v2197_v40 = vpop.permute.xlu2 %2196  ;;  %vm4482_vm3 = vmmov %vm4480_vm1 }
 0x4ad   : > { %v2205_v16 = vperm.slane %v2197_v40, %v4477_v58  ;;  %vm4483_vm4 = vmmov %vm4480_vm1 }
 0x4ae   : > { %vm4484_vm5 = vmmov %vm4480_vm1 }
 0x4af   : > { %2427 = vperm.xlu0 %2752, %v2081_v0   ;;  %vm4485_vm6 = vmmov %vm4480_vm1 }
 0x4b0   : > { %2472 = vperm.xlu2 %2754, %v2141_v26   ;;  %vm4486_vm15 = vmmov %vm4480_vm1 }
 0x4b4   : > { %v2203_v41 = vpop.permute.xlu2 %2202 }
 0x4b5   : > { %v2148_v29 = vpop.permute.xlu0 %2147  ;;  %v2207_v60 = vperm.slane %v2203_v41, %v4477_v58 }
 0x4b6   : > { %v2158_v61 = vperm.slane %v2148_v29, %v4477_v58 }
 0x4b8   : > { %v2154_v44 = vpop.permute.xlu1 %2153  ;;  %v2162_v17 = vsel %vm1146_vm9, %v2159_v35, %v2158_v61 }
 0x4b9   : > { %v2160_v45 = vperm.slane %v2154_v44, %v4477_v58 }
 0x4bb   : > { %v2163_v32 = vsel %vm1148_vm10, %v2160_v45, %v2162_v17 }
 0x4bd   : > { %v2157_v11 = vpop.permute.xlu0 %2156  ;;  %v2422_v55 = vpop.permute.xlu2 %2421 }
 0x4be   : > { %v2161_v54 = vperm.slane %v2157_v11, %v4477_v58  ;;  %v2430_v25 = vperm.slane %v2422_v55, %v4477_v58 }
 0x4c0   : > { %v2164_v51 = vsel %vm4478_vm11, %v2161_v54, %v2163_v32 }
 0x4c1   : > { %2688 = vmatmul.msk.f32.vlgmr.msrb.gmra.mxu2 %vm2165_vm13, %v2164_v51 }
 0x4c2   : > { %2363 = vmatpush.msrb.mxu2 %v2900_v8 }
 0x4c4   : > { %v2200_v1 = vpop.permute.xlu1 %2199 }
 0x4c5   : > { %v2206_v2 = vperm.slane %v2200_v1, %v4477_v58 }
 0x4c7   : > { %v2194_v37 = vpop.permute.xlu0 %2193 }
 0x4c8   : > { %v2204_v49 = vperm.slane %v2194_v37, %v4477_v58  ;;  %v2245_v10 = vpop.permute.xlu2 %2244 }
 0x4c9   : > { %v2251_v39 = vperm.slane %v2245_v10, %v4477_v58 }
 0x4ca   : > { %v2208_v62 = vsel %vm1146_vm9, %v2205_v16, %v2204_v49 }
 0x4cb   : > { %v2209_v15 = vsel %vm1148_vm10, %v2206_v2, %v2208_v62 }
 0x4cc   : > { %v2210_v52 = vsel %vm4479_vm14, %v2207_v60, %v2209_v15 }
 0x4cd   : > { %2689 = vmatmul.msk.f32.vlgmr.msrb.gmra.mxu3 %vm2165_vm13, %v2210_v52 }
 0x4ce   : > { %v2419_v50 = vpop.permute.xlu1 %2418  ;;  %2408 = vmatpush.msrb.mxu3 %v2901_v5 }
 0x4cf   : > { %v2429_v47 = vperm.slane %v2419_v50, %v4477_v58 }
 0x4d0   : > { %v2248_v31 = vpop.permute.xlu2 %2247 }
 0x4d1   : > { %v2433_v3 = vsel %vm1146_vm9, %v2430_v25, %v2429_v47  ;;  %v2252_v33 = vperm.slane %v2248_v31, %v4477_v58 }
 0x4d2   : > { %v2425_v56 = vpop.permute.xlu0 %2424 }
 0x4d3   : > { %v2431_v12 = vperm.slane %v2425_v56, %v4477_v58 }
 0x4d5   : > { %v4295_v27 = vsel %vm1148_vm10, %v2431_v12, %v2433_v3 }
 0x4da   : > { %v2242_v28 = vpop.permute.xlu1 %2241 }
 0x4db   : > { %v2250_v20 = vperm.slane %v2242_v28, %v4477_v58  ;;  %v2503_v28 = vld [vmem:[%s4401_s4] sm:$0xf] }
 0x4de   : > { %v2239_v9 = vpop.permute.xlu0 %2238 }
 0x4df   : > { %v2249_v38 = vperm.slane %v2239_v9, %v4477_v58 }
 0x4e1   : > { %v2253_v57 = vsel %vm1146_vm9, %v2250_v20, %v2249_v38 }
 0x4e2   : > { %v2254_v21 = vsel %vm1148_vm10, %v2251_v39, %v2253_v57 }
 0x4e3   : > { %v2255_v53 = vsel %vm4480_vm1, %v2252_v33, %v2254_v21 }
 0x4e4   : > { %2690 = vmatmul.msk.f32.vlgmr.msra.gmra.mxu2 %vm2165_vm13, %v2255_v53 }
 0x4e5   : > { %2453 = vmatpush.msra.mxu2 %v2902_v6 }
 0x4e6   : > { %v2329_v30 = vpop.permute.xlu2 %2328 }
 0x4e7   : > { %v2339_v23 = vperm.slane %v2329_v30, %v4477_v58 }
 0x4e9   : > { %v2464_v19 = vpop.permute.xlu1 %2463 }
 0x4ea   : > { %v2474_v55 = vperm.slane %v2464_v19, %v4477_v58 }
 0x4f0   : > { %v2374_v46 = vpop.permute.xlu2 %2373 }
 0x4f1   : > { %v2384_v54 = vperm.slane %v2374_v46, %v4477_v58 }
 0x4f2   : > { %v2287_v14 = vpop.permute.xlu1 %2286 }
 0x4f3   : > { %v2295_v36 = vperm.slane %v2287_v14, %v4477_v58 }
 0x4f4   : > { %v2284_v4 = vpop.permute.xlu0 %2283 }
 0x4f5   : > { %v2294_v59 = vperm.slane %v2284_v4, %v4477_v58 }
 0x4f7   : > { %v2298_v63 = vsel %vm1146_vm9, %v2295_v36, %v2294_v59 }
 0x4f9   : > { %v2380_v40 = vpop.permute.xlu2 %2379 }
 0x4fa   : > { %v2293_v18 = vpop.permute.xlu1 %2292  ;;  %v2386_v51 = vperm.slane %v2380_v40, %v4477_v58 }
 0x4fb   : > { %v2297_v34 = vperm.slane %v2293_v18, %v4477_v58 }
 0x4ff   : > { %v2290_v7 = vpop.permute.xlu0 %2289 }
 0x500   : > { %v2296_v13 = vperm.slane %v2290_v7, %v4477_v58 }
 0x502   : > { %v2299_v48 = vsel %vm1148_vm10, %v2296_v13, %v2298_v63  ;;  %v2335_v24 = vpop.permute.xlu1 %2334  ;;  %v2467_v41 = vpop.permute.xlu2 %2466 }
 0x503   : > { %v2300_v22 = vsel %vm4481_vm2, %v2297_v34, %v2299_v48  ;;  %v2341_v43 = vperm.slane %v2335_v24, %v4477_v58  ;;  %v2475_v49 = vperm.slane %v2467_v41, %v4477_v58 }
 0x504   : > { %2691 = vmatmul.msk.f32.vlgmr.msra.gmra.mxu3 %vm2165_vm13, %v2300_v22 }
 0x505   : > { %2498 = vmatpush.msra.mxu3 %v2903_v42  ;;  %v2478_v15 = vsel %vm1146_vm9, %v2475_v49, %v2474_v55 }
 0x509   : > { %v2332_v0 = vpop.permute.xlu0 %2331 }
 0x50a   : > { %v2340_v26 = vperm.slane %v2332_v0, %v4477_v58  ;;  %v2473_v62 = vpop.permute.xlu2 %2472 }
 0x50b   : > { %v2338_v29 = vpop.permute.xlu1 %2337  ;;  %v2477_v5 = vperm.slane %v2473_v62, %v4477_v58 }
 0x50c   : > { %v2343_v44 = vsel %vm1146_vm9, %v2340_v26, %v2339_v23  ;;  %v2342_v61 = vperm.slane %v2338_v29, %v4477_v58 }
 0x50d   : > { %v2344_v35 = vsel %vm1148_vm10, %v2341_v43, %v2343_v44 }
 0x50e   : > { %v2345_v45 = vsel %vm4482_vm3, %v2342_v61, %v2344_v35 }
 0x50f   : > { %2692 = vmatmul.msk.f32.vlgmr.msrb.gmra.mxu2 %vm2165_vm13, %v2345_v45 }
 0x511   : > { %v2377_v17 = vpop.permute.xlu0 %2376 }
 0x512   : > { %v2385_v11 = vperm.slane %v2377_v17, %v4477_v58 }
 0x514   : > { %v2388_v32 = vsel %vm1146_vm9, %v2385_v11, %v2384_v54  ;;  %v2470_v1 = vpop.permute.xlu1 %2469 }
 0x515   : > { %v2389_v16 = vsel %vm1148_vm10, %v2386_v51, %v2388_v32  ;;  %v2476_v60 = vperm.slane %v2470_v1, %v4477_v58 }
 0x517   : > { %v2479_v52 = vsel %vm1148_vm10, %v2476_v60, %v2478_v15 }
 0x518   : > { %v2480_v3 = vsel %vm4485_vm6, %v2477_v5, %v2479_v52 }
 0x519   : > { %v2383_v8 = vpop.permute.xlu0 %2382 }
 0x51a   : > { %v2387_v37 = vperm.slane %v2383_v8, %v4477_v58 }
 0x51c   : > { %v2390_v2 = vsel %vm4483_vm4, %v2387_v37, %v2389_v16 }
 0x51d   : > { %2693 = vmatmul.msk.f32.vlgmr.msrb.gmra.mxu3 %vm2165_vm13, %v2390_v2 }
 0x521   : > { %v2428_v50 = vpop.permute.xlu0 %2427 }
 0x522   : > { %v2432_v25 = vperm.slane %v2428_v50, %v4477_v58 }
 0x524   : > { %v2435_v47 = vsel %vm4484_vm5, %v2432_v25, %v4295_v27 }
 0x525   : > { %2694 = vmatmul.msk.f32.vlgmr.msra.gmra.mxu2 %vm2165_vm13, %v2435_v47  ;;  %2695 = vmatmul.msk.f32.vlgmr.msra.gmra.mxu3 %vm2165_vm13, %v2480_v3  ;;  %vm2586_vm13 = vcmask 1047559  }
 0x544   : > { %v2185_v56 = vpop.f32.mrf.mxu2 }
 0x545   : > { %v2504_v38 = vmul.f32 %v2503_v28, %v2185_v56 }
 0x547   : > { %v2513_v21 = vsel %vm2512_vm7, %v2504_v38, 0.0 }
 0x548   : > { %v2514_v4 = vrot.slane %v2513_v21, 4 }
 0x54a   : > { %v2515_v7 = vadd.f32 %v2514_v4, %v2513_v21 }
 0x54c   : > { %v2516_v43 = vrot.slane %v2515_v7, 2 }
 0x54e   : > { %v2517_v45 = vadd.f32 %v2516_v43, %v2515_v7 }
 0x550   : > { %v2230_v10 = vpop.f32.mrf.mxu3  ;;  %v2518_v2 = vrot.slane %v2517_v45, 1 }
 0x551   : > { %v2505_v9 = vmul.f32 %v2503_v28, %v2230_v10 }
 0x552   : > { %v2519_v3 = vadd.f32 %v2518_v2, %v2517_v45 }
 0x553   : > { %v2520_v33 = vsel %vm2512_vm7, %v2505_v9, 0.0 }
 0x554   : > { %v2521_v6 = vrot.slane %v2520_v33, 4 }
 0x556   : > { %v2522_v36 = vadd.f32 %v2521_v6, %v2520_v33 }
 0x558   : > { %v2523_v48 = vrot.slane %v2522_v36, 2 }
 0x55a   : > { %v2524_v40 = vadd.f32 %v2523_v48, %v2522_v36 }
 0x55c   : > { %v2525_v32 = vrot.slane %v2524_v40, 1 }
 0x55e   : > { %v2526_v52 = vadd.f32 %v2525_v32, %v2524_v40 }
 0x567   : > { %v2275_v12 = vpop.f32.mrf.mxu2 }
 0x568   : > { %v2506_v58 = vmul.f32 %v2503_v28, %v2275_v12 }
 0x56a   : > { %v2527_v57 = vsel %vm2512_vm7, %v2506_v58, 0.0 }
 0x56b   : > { %v2528_v14 = vrot.slane %v2527_v57, 4 }
 0x56d   : > { %v2529_v59 = vadd.f32 %v2528_v14, %v2527_v57 }
 0x56f   : > { %v2530_v22 = vrot.slane %v2529_v59, 2 }
 0x571   : > { %v2531_v29 = vadd.f32 %v2530_v22, %v2529_v59 }
 0x573   : > { %v2532_v37 = vrot.slane %v2531_v29, 1 }
 0x575   : > { %v2533_v5 = vadd.f32 %v2532_v37, %v2531_v29 }
 0x587   : > { %v2320_v31 = vpop.f32.mrf.mxu3 }
 0x588   : > { %v2507_v39 = vmul.f32 %v2503_v28, %v2320_v31  ;;  %v2577_v31 = vsel %vm1146_vm9, %v2526_v52, %v2519_v3  ;;  %vm4487_vm9 = vcmask 261120  }
 0x58a   : > { %v2534_v53 = vsel %vm2512_vm7, %v2507_v39, 0.0 }
 0x58b   : > { %v2535_v30 = vrot.slane %v2534_v53, 4 }
 0x58d   : > { %v2536_v13 = vadd.f32 %v2535_v30, %v2534_v53 }
 0x58f   : > { %v2537_v0 = vrot.slane %v2536_v13, 2 }
 0x591   : > { %v2538_v17 = vadd.f32 %v2537_v0, %v2536_v13 }
 0x592   : > { %v2365_v20 = vpop.f32.mrf.mxu2 }
 0x593   : > { %v2508_v27 = vmul.f32 %v2503_v28, %v2365_v20  ;;  %v2539_v60 = vrot.slane %v2538_v17, 1  ;;  %v2578_v20 = vsel %vm1148_vm10, %v2533_v5, %v2577_v31 }
 0x595   : > { %v2541_v19 = vsel %vm2512_vm7, %v2508_v27, 0.0  ;;  %v2540_v56 = vadd.f32 %v2539_v60, %v2538_v17 }
 0x596   : > { %v2542_v18 = vrot.slane %v2541_v19, 4 }
 0x597   : > { %v2579_v39 = vsel %vm4486_vm15, %v2540_v56, %v2578_v20 }
 0x598   : > { %v2543_v63 = vadd.f32 %v2542_v18, %v2541_v19 }
 0x59a   : > { %v2544_v23 = vrot.slane %v2543_v63, 2 }
 0x59c   : > { %v2545_v54 = vadd.f32 %v2544_v23, %v2543_v63 }
 0x59e   : > { %v2546_v55 = vrot.slane %v2545_v54, 1 }
 0x5a0   : > { %v2410_v34 = vpop.f32.mrf.mxu3  ;;  %v2547_v10 = vadd.f32 %v2546_v55, %v2545_v54 }
 0x5a1   : > { %v2509_v46 = vmul.f32 %v2503_v28, %v2410_v34 }
 0x5a2   : > { %v2581_v27 = vsel %vm2580_vm8, %v2547_v10, %v2579_v39 }
 0x5a3   : > { %v2548_v24 = vsel %vm2512_vm7, %v2509_v46, 0.0 }
 0x5a4   : > { %v2549_v42 = vrot.slane %v2548_v24, 4 }
 0x5a6   : > { %v2550_v26 = vadd.f32 %v2549_v42, %v2548_v24 }
 0x5a8   : > { %v2551_v44 = vrot.slane %v2550_v26, 2  ;;  %v2455_v61 = vpop.f32.mrf.mxu2  ;;  %v2500_v35 = vpop.f32.mrf.mxu3 }
 0x5a9   : > { %v2510_v11 = vmul.f32 %v2503_v28, %v2455_v61  ;;  %v2511_v41 = vmul.f32 %v2503_v28, %v2500_v35 }
 0x5aa   : > { %v2552_v51 = vadd.f32 %v2551_v44, %v2550_v26 }
 0x5ab   : > { %v2555_v8 = vsel %vm2512_vm7, %v2510_v11, 0.0  ;;  %v2562_v1 = vsel %vm2512_vm7, %v2511_v41, 0.0 }
 0x5ac   : > { %v2556_v16 = vrot.slane %v2555_v8, 4  ;;  %v2563_v49 = vrot.slane %v2562_v1, 4  ;;  %v2553_v50 = vrot.slane %v2552_v51, 1 }
 0x5ae   : > { %v2557_v62 = vadd.f32 %v2556_v16, %v2555_v8  ;;  %v2564_v15 = vadd.f32 %v2563_v49, %v2562_v1  ;;  %v2554_v9 = vadd.f32 %v2553_v50, %v2552_v51 }
 0x5b0   : > { %v2558_v25 = vrot.slane %v2557_v62, 2  ;;  %v2565_v47 = vrot.slane %v2564_v15, 2  ;;  %v2583_v21 = vsel %vm2582_vm12, %v2554_v9, %v2581_v27 }
 0x5b2   : > { %v2559_v12 = vadd.f32 %v2558_v25, %v2557_v62  ;;  %v2566_v28 = vadd.f32 %v2565_v47, %v2564_v15 }
 0x5b4   : > { %v2560_v58 = vrot.slane %v2559_v12, 1  ;;  %v2567_v38 = vrot.slane %v2566_v28, 1 }
 0x5b6   : > { %v2561_v33 = vadd.f32 %v2560_v58, %v2559_v12  ;;  %v2568_v57 = vadd.f32 %v2567_v38, %v2566_v28 }
 0x5b8   : > { %v2585_v53 = vsel %vm2584_vm0, %v2561_v33, %v2583_v21 }
 0x5b9   : > { %v2587_v6 = vsel %vm2586_vm13, %v2568_v57, %v2585_v53 }
 0x5ba   : > { %2589 = vst.msk [vmem:[%s218_s25] sm:$0xff] %vm4487_vm9, %v2587_v6 }
 0x5bb   : > { %2931 = shalt.err (!%p2928_p3)
}
 0x5bc   : > { %2708 = dma.vmem_to_hbm [thread:$0]  (%p3034_p5), %s2604_s26, 128, %s2606_s30, %s2591_s9  }
 0x5bd PF: > { %p2714_p4 = scmp.ge.s32.totalorder %s2966_s21, 2  ;;  %s2617_s14 = sand.u32 1, %s2954_s18  }
 0x5be   : > { %s2618_s15 = scalar_lea.sflag [#allocation3], %s2617_s14 }
 0x5bf   : > { %p2711_p7 = pnand %p2714_p4, %p3038_p6 }
 0x5c1   : > { %p2712_p8 = pneg %p2711_p7 }
 0x5c3   : > { %2949 = dma.done.wait (%p2712_p8), %s2618_s15, 128  }
 0x5c4   : > { %2951 = vsyncadd (%p2712_p8), %s2618_s15, 4294967168  ;;  %p15_p9 = scmp.ge.s32.totalorder %s3022_s24, 4   ;;  %s4488_s18 = smov %s2958_s19 }
 0x5c5   : > { %s4489_s19 = smov %s2962_s20  ;;  %s4490_s20 = smov %s3032_s27 }
 0x5c6   : > { %s4491_s21 = smov %s3022_s24  ;;  %17 = sbr.rel (!%p15_p9) target bundleno = 3 (0x3), region = 75 }
 0x5cb   :  { %2624 = vsyncpa [#allocation3], 1 }
 0x5cc   :  { %2626 = vsyncpa [#allocation3 + $0x1], 1 }

</bundles_post_ra>
